<compile_context>
chip_gen: v6e
topology: v6e:2x2x1
jax: 0.10.0
libtpu: 0.0.40
codegen_flags: <defaults>
</compile_context>

<pallas_src>
import functools

import jax
import jax.numpy as jnp
from jax import lax
from jax.experimental import pallas as pl
from jax.experimental.pallas import tpu as pltpu


def _conv_rows(x_ref, w_ref, j, tile_h):
    """3x3 conv for one row tile as a single im2col MXU matmul (bf16 in, f32 accum).

    x_ref : [1, H+2, W+2, C_in]  whole padded NHWC image for this batch element (bf16)
    w_ref : [9*C_in, C_out]      conv weight, rows ordered (ky, kx, c_in) (bf16)
    returns f32 [tile_h * W, C_out]
    """
    w_out = x_ref.shape[2] - 2
    c_in = x_ref.shape[3]
    row0 = pl.multiple_of(j * tile_h, tile_h)
    # Single overlapping (tile_h+2)-row window sliced out of the resident padded image
    # (replaces the previous 3-view halo + in-kernel concatenate: no extra DMA streams,
    # no slab copy through the vld/vst slots).
    slab = x_ref[0, pl.ds(row0, tile_h + 2), :, :]                      # [th+2, W+2, C_in]
    # im2col with channel order (ky, kx, c_in), matching w_ref's row order.
    xshift = jnp.concatenate(
        [slab[:, dx:dx + w_out, :] for dx in range(3)], axis=-1)        # [th+2, W, 3*C_in]
    patch3 = jnp.concatenate(
        [xshift[dy:dy + tile_h] for dy in range(3)], axis=-1)           # [th,   W, 9*C_in]
    patch = patch3.reshape(tile_h * w_out, 9 * c_in)                    # [th*W, 9*C_in]
    return jnp.dot(patch, w_ref[...], preferred_element_type=jnp.float32)


def _conv_stats_kernel(x_ref, w_ref, stats_ref, *, tile_h):
    """Pass 1: conv on one (batch, row-tile) block -> per-tile BN partial statistics.

    stats_ref : [1, 1, 2, C_out] f32 = [channel sum, channel M2 about the tile mean].
    Only this tiny tensor reaches HBM; the conv activations never leave VMEM.
    """
    acc = _conv_rows(x_ref, w_ref, pl.program_id(1), tile_h)            # [R, C_out] f32
    n_rows = acc.shape[0]
    s = jnp.sum(acc, axis=0, keepdims=True)                             # [1, C_out]
    d = acc - s * (1.0 / n_rows)                                        # center -> robust var
    m2 = jnp.sum(d * d, axis=0, keepdims=True)                          # [1, C_out]
    stats_ref[...] = jnp.concatenate([s, m2], axis=0).reshape(stats_ref.shape)


def _conv_bn_relu_kernel(x_ref, w_ref, scale_ref, shift_ref, out_ref, *, tile_h):
    """Pass 2: recompute conv, apply BN scale/shift + ReLU, store an NCHW block directly."""
    acc = _conv_rows(x_ref, w_ref, pl.program_id(1), tile_h)            # [R, C_out] f32
    y = jnp.maximum(acc * scale_ref[...] + shift_ref[...], 0.0)         # f32 BN apply + ReLU
    # Fused channel-strip + NHWC->NCHW: (R, C_out) -> (C_out, R) -> (1, C_out, th, W).
    out_ref[...] = jnp.transpose(y, (1, 0)).reshape(out_ref.shape).astype(out_ref.dtype)


def _pick_tile_h(H, W, target_rows=1024):
    """Row-tile height: divides H, multiple of 8 (or == H), ~target_rows rows per step."""
    cap = max(1, target_rows // max(1, W))
    if H <= cap:
        return H
    divs = [d for d in range(8, H + 1, 8) if H % d == 0]
    if not divs:
        return H
    small = [d for d in divs if d <= cap]
    return max(small) if small else min(divs)


def encoder_block(x_nchw, w_oihw, gamma, beta, eps=1e-5, tile_h=None):
    """Forward of EncoderBlock(use_bn=True). Input/output are NCHW like PyTorch."""
    N, C_in, H, W = x_nchw.shape
    C_out = w_oihw.shape[0]

    if tile_h is None:
        tile_h = _pick_tile_h(H, W)
    if H % tile_h != 0:
        raise ValueError(f"tile_h={tile_h} must divide H={H}")
    if tile_h % 8 != 0 and tile_h != H:
        raise ValueError(f"tile_h={tile_h} must be a multiple of 8 or equal H={H}")
    n_ht = H // tile_h

    compute_dtype = jnp.bfloat16  # MXU operand dtype (f32 accumulation inside the kernel)

    # Single fused layout op on the small (C_in-channel) input: NCHW->NHWC + 1px halo
    # + bf16 cast.  Shared by both kernel passes.
    # TODO(synk): fold this into the kernels with manual DMA + boundary masking.
    xpad = jnp.pad(jnp.transpose(x_nchw, (0, 2, 3, 1)),
                   ((0, 0), (1, 1), (1, 1), (0, 0))).astype(compute_dtype)

    # Conv weight OIHW -> HWIO -> [9*C_in, C_out], rows ordered (ky, kx, c_in).
    w2 = jnp.transpose(w_oihw, (2, 3, 1, 0)).reshape(9 * C_in, C_out).astype(compute_dtype)

    # VMEM budget from the actual tile footprint.  Cap well under v7x's 64 MiB physical
    # per-TC VMEM; on v5e/v6e (128 MiB) a larger tile could justify going higher.
    cdt_bytes = jnp.dtype(compute_dtype).itemsize
    out_bytes = jnp.dtype(x_nchw.dtype).itemsize
    est = (2 * (H + 2) * (W + 2) * C_in * cdt_bytes        # double-buffered padded image
           + 2 * 9 * C_in * C_out * cdt_bytes              # weight
           + 2 * max(C_out * tile_h * W * out_bytes, 8 * C_out)   # output / stats tile
           + tile_h * W * 9 * C_in * cdt_bytes             # im2col patch
           + 4 * tile_h * W * C_out * 4)                   # f32 acc + BN/transpose temps
    vmem_limit = int(min(48 * 2**20, max(16 * 2**20, 4 * est)))

    grid = (N, n_ht)
    cparams = pltpu.CompilerParams(
        dimension_semantics=("parallel", "parallel"),
        vmem_limit_bytes=vmem_limit)

    # Padded image is resident per batch element (index map constant along the row-tile
    # axis, so it is fetched once per n); the kernel slices its overlapping halo window.
    x_spec = pl.BlockSpec((1, H + 2, W + 2, C_in), lambda n, j: (n, 0, 0, 0))
    w_spec = pl.BlockSpec((9 * C_in, C_out), lambda n, j: (0, 0))

    # ---- Pass 1: conv + per-tile partial BN statistics (only stats hit HBM) ----------
    stats = pl.pallas_call(
        functools.partial(_conv_stats_kernel, tile_h=tile_h),
        grid=grid,
        in_specs=[x_spec, w_spec],
        out_specs=pl.BlockSpec((1, 1, 2, C_out), lambda n, j: (n, j, 0, 0)),
        out_shape=jax.ShapeDtypeStruct((N, n_ht, 2, C_out), jnp.float32),
        compiler_params=cparams,
    )(xpad, w2)

    # ---- Tiny cross-tile reduction (Chan's combination -> no cancellation) -----------
    n_t = jnp.float32(tile_h * W)                       # elements per tile (all equal)
    count = jnp.float32(N * H * W)
    sum_t = stats[:, :, 0, :]                           # [N, n_ht, C_out]
    m2_t = stats[:, :, 1, :]                            # [N, n_ht, C_out]
    mean = jnp.sum(sum_t, axis=(0, 1)) / count          # [C_out]
    mean_t = sum_t / n_t
    m2 = jnp.sum(m2_t, axis=(0, 1)) + n_t * jnp.sum(jnp.square(mean_t - mean), axis=(0, 1))
    var = jnp.maximum(m2 / count, 0.0)                  # biased variance (training mode)
    scale_v = gamma.astype(jnp.float32) * lax.rsqrt(var + eps)
    shift_v = beta.astype(jnp.float32) - mean * scale_v
    scale = scale_v.reshape(1, C_out)
    shift = shift_v.reshape(1, C_out)

    # ---- Pass 2: recompute conv, BN apply + ReLU, write NCHW output directly ---------
    y = pl.pallas_call(
        functools.partial(_conv_bn_relu_kernel, tile_h=tile_h),
        grid=grid,
        in_specs=[x_spec, w_spec,
                  pl.BlockSpec((1, C_out), lambda n, j: (0, 0)),
                  pl.BlockSpec((1, C_out), lambda n, j: (0, 0))],
        out_specs=pl.BlockSpec((1, C_out, tile_h, W), lambda n, j: (n, 0, j, 0)),
        out_shape=jax.ShapeDtypeStruct((N, C_out, H, W), x_nchw.dtype),
        compiler_params=cparams,
    )(xpad, w2, scale, shift)
    return y


def encoder_block_ref(x_nchw, w_oihw, gamma, beta, eps=1e-5):
    """Pure-JAX reference (matches PyTorch training-mode forward)."""
    conv = lax.conv_general_dilated(
        x_nchw.astype(jnp.float32), w_oihw.astype(jnp.float32),
        window_strides=(1, 1), padding=((1, 1), (1, 1)),
        dimension_numbers=("NCHW", "OIHW", "NCHW"),
        precision=lax.Precision.HIGHEST)
    mean = jnp.mean(conv, axis=(0, 2, 3), keepdims=True)
    var = jnp.mean(jnp.square(conv - mean), axis=(0, 2, 3), keepdims=True)
    g = gamma.reshape(1, -1, 1, 1)
    b = beta.reshape(1, -1, 1, 1)
    y = g * (conv - mean) * lax.rsqrt(var + eps) + b
    return jnp.maximum(y, 0.0).astype(x_nchw.dtype)


if __name__ == "__main__":
    # Small, deterministic setup consistent with the module.
    N, C_in, C_out, H, W = 2, 4, 8, 16, 16
    key = jax.random.PRNGKey(0)
    kx, kw, kg, kb = jax.random.split(key, 4)

    x = jax.random.normal(kx, (N, C_in, H, W), dtype=jnp.float32)
    # Conv2d weight [C_out, C_in, 3, 3]; bias=False because use_bn=True.
    w = jax.random.normal(kw, (C_out, C_in, 3, 3), dtype=jnp.float32) * 0.1
    # BatchNorm2d affine params (non-trivial to exercise scale/shift).
    gamma = 1.0 + 0.1 * jax.random.normal(kg, (C_out,), dtype=jnp.float32)
    beta = 0.1 * jax.random.normal(kb, (C_out,), dtype=jnp.float32)

    # Reference with the same bf16-quantized conv operands (the kernel's documented MXU
    # precision): tight tolerance validates halo/im2col indexing, BN math and layout.
    xq = x.astype(jnp.bfloat16).astype(jnp.float32)
    wq = w.astype(jnp.bfloat16).astype(jnp.float32)
    ref_q = encoder_block_ref(xq, wq, gamma, beta)
    # Full-f32 reference: loose tolerance confirms end-to-end module semantics.
    ref_f32 = encoder_block_ref(x, w, gamma, beta)

    # Multi-tile path (exercises the overlapping halo window, the grid and the
    # cross-tile statistics combination).
    fwd_tiled = jax.jit(functools.partial(encoder_block, tile_h=8))
    out_tiled = jax.block_until_ready(fwd_tiled(x, w, gamma, beta))
    assert out_tiled.shape == (N, C_out, H, W)
    assert jnp.allclose(out_tiled, ref_q, rtol=2e-3, atol=2e-3), "mismatch vs bf16 ref (tile_h=8)"
    assert jnp.allclose(out_tiled, ref_f32, rtol=3e-2, atol=3e-2), "mismatch vs f32 ref (tile_h=8)"

    # Default (heuristic) tile size.
    fwd_auto = jax.jit(encoder_block)
    out_auto = jax.block_until_ready(fwd_auto(x, w, gamma, beta))
    assert jnp.allclose(out_auto, ref_q, rtol=2e-3, atol=2e-3), "mismatch vs bf16 ref (auto tile)"

    print("KERNEL_OK")
</pallas_src>

<mosaic_0001>
module attributes {stable_mosaic.version = 11 : i64} {
  func.func @_conv_stats_kernel(%arg0: i32, %arg1: i32, %arg2: memref<1x18x18x4xbf16, #tpu.memory_space<vmem>>, %arg3: memref<36x8xbf16, #tpu.memory_space<vmem>>, %arg4: memref<1x1x2x8xf32, #tpu.memory_space<vmem>>) attributes {dimension_semantics = [#tpu.dimension_semantics<parallel>, #tpu.dimension_semantics<parallel>], iteration_bounds = array<i64: 2, 2>, scalar_prefetch = 0 : i64, scratch_operands = 0 : i64, tpu.core_type = #tpu.core_type<tc>, window_params = [{transform_indices = @transform_0, window_bounds = array<i64: 1, 18, 18, 4>}, {pipeline_mode = #tpu.pipeline_mode<synchronous>, transform_indices = @transform_1, window_bounds = array<i64: 36, 8>}, {transform_indices = @transform_2, window_bounds = array<i64: 1, 1, 2, 8>}]} {
    %c8_i32 = arith.constant 8 : i32
    %0 = arith.muli %arg1, %c8_i32 : i32
    %1 = tpu.assume_multiple %0, 8 : i32
    %c0 = arith.constant 0 : index
    %2 = arith.index_cast %1 : i32 to index
    %c0_0 = arith.constant 0 : index
    %c0_1 = arith.constant 0 : index
    %3 = vector.load %arg2[%c0, %2, %c0_0, %c0_1] : memref<1x18x18x4xbf16, #tpu.memory_space<vmem>>, vector<1x10x18x4xbf16>
    %4 = vector.shape_cast %3 : vector<1x10x18x4xbf16> to vector<10x18x4xbf16>
    %5 = vector.extract_strided_slice %4 {offsets = [0, 0, 0], sizes = [10, 16, 4], strides = [1, 1, 1]} : vector<10x18x4xbf16> to vector<10x16x4xbf16>
    %6 = vector.extract_strided_slice %4 {offsets = [0, 1, 0], sizes = [10, 16, 4], strides = [1, 1, 1]} : vector<10x18x4xbf16> to vector<10x16x4xbf16>
    %7 = vector.extract_strided_slice %4 {offsets = [0, 2, 0], sizes = [10, 16, 4], strides = [1, 1, 1]} : vector<10x18x4xbf16> to vector<10x16x4xbf16>
    %8 = tpu.concatenate %5, %6, %7 in 2 : vector<10x16x4xbf16>, vector<10x16x4xbf16>, vector<10x16x4xbf16> -> vector<10x16x12xbf16>
    %9 = vector.extract_strided_slice %8 {offsets = [0, 0, 0], sizes = [8, 16, 12], strides = [1, 1, 1]} : vector<10x16x12xbf16> to vector<8x16x12xbf16>
    %10 = vector.extract_strided_slice %8 {offsets = [1, 0, 0], sizes = [8, 16, 12], strides = [1, 1, 1]} : vector<10x16x12xbf16> to vector<8x16x12xbf16>
    %11 = vector.extract_strided_slice %8 {offsets = [2, 0, 0], sizes = [8, 16, 12], strides = [1, 1, 1]} : vector<10x16x12xbf16> to vector<8x16x12xbf16>
    %12 = tpu.concatenate %9, %10, %11 in 2 : vector<8x16x12xbf16>, vector<8x16x12xbf16>, vector<8x16x12xbf16> -> vector<8x16x36xbf16>
    %13 = vector.shape_cast %12 : vector<8x16x36xbf16> to vector<128x36xbf16>
    %c0_2 = arith.constant 0 : index
    %c0_3 = arith.constant 0 : index
    %14 = vector.load %arg3[%c0_2, %c0_3] : memref<36x8xbf16, #tpu.memory_space<vmem>>, vector<36x8xbf16>
    %cst = arith.constant dense<0.000000e+00> : vector<128x8xf32>
    %15 = tpu.matmul %13, %14, %cst {dimension_numbers = #tpu.dot_dimension_numbers<[1], [0], [0], [1], [0, 0, 1, 1], [], []>} : vector<128x36xbf16>, vector<36x8xbf16>, vector<128x8xf32> -> vector<128x8xf32>
    %cst_4 = arith.constant dense<0.000000e+00> : vector<8xf32>
    %16 = vector.multi_reduction <add>, %15, %cst_4 [0] : vector<128x8xf32> to vector<8xf32>
    %17 = vector.shape_cast %16 : vector<8xf32> to vector<1x8xf32>
    %cst_5 = arith.constant 7.812500e-03 : f32
    %18 = vector.broadcast %cst_5 : f32 to vector<1x8xf32>
    %19 = arith.mulf %17, %18 : vector<1x8xf32>
    %20 = vector.broadcast %19 : vector<1x8xf32> to vector<128x8xf32>
    %21 = arith.subf %15, %20 : vector<128x8xf32>
    %22 = arith.mulf %21, %21 : vector<128x8xf32>
    %cst_6 = arith.constant dense<0.000000e+00> : vector<8xf32>
    %23 = vector.multi_reduction <add>, %22, %cst_6 [0] : vector<128x8xf32> to vector<8xf32>
    %24 = vector.shape_cast %23 : vector<8xf32> to vector<1x8xf32>
    %25 = tpu.concatenate %17, %24 in 0 : vector<1x8xf32>, vector<1x8xf32> -> vector<2x8xf32>
    %26 = vector.shape_cast %25 : vector<2x8xf32> to vector<1x1x2x8xf32>
    %c0_7 = arith.constant 0 : index
    %c0_8 = arith.constant 0 : index
    %c0_9 = arith.constant 0 : index
    %c0_10 = arith.constant 0 : index
    %27 = vector.load %arg4[%c0_7, %c0_8, %c0_9, %c0_10] : memref<1x1x2x8xf32, #tpu.memory_space<vmem>>, vector<1x1x2x8xf32>
    tpu.vector_store %arg4[%c0_7, %c0_8, %c0_9, %c0_10], %26 {strides = array<i32>} : memref<1x1x2x8xf32, #tpu.memory_space<vmem>>, vector<1x1x2x8xf32>,
    return
  }
  func.func @transform_0(%arg0: i32, %arg1: i32) -> (i32, i32, i32, i32) {
    %c0_i32 = arith.constant 0 : i32
    %c0_i32_0 = arith.constant 0 : i32
    %c0_i32_1 = arith.constant 0 : i32
    %c0_i32_2 = arith.constant 0 : i32
    return %arg0, %c0_i32, %c0_i32_0, %c0_i32_1 : i32, i32, i32, i32
  }
  func.func @transform_1(%arg0: i32, %arg1: i32) -> (i32, i32) {
    %c0_i32 = arith.constant 0 : i32
    %c0_i32_0 = arith.constant 0 : i32
    %c0_i32_1 = arith.constant 0 : i32
    return %c0_i32, %c0_i32_0 : i32, i32
  }
  func.func @transform_2(%arg0: i32, %arg1: i32) -> (i32, i32, i32, i32) {
    %c0_i32 = arith.constant 0 : i32
    %c0_i32_0 = arith.constant 0 : i32
    %c0_i32_1 = arith.constant 0 : i32
    return %arg0, %arg1, %c0_i32, %c0_i32_0 : i32, i32, i32, i32
  }
}

module attributes {stable_mosaic.version = 11 : i64} {
  func.func @_conv_bn_relu_kernel(%arg0: i32, %arg1: i32, %arg2: memref<1x18x18x4xbf16, #tpu.memory_space<vmem>>, %arg3: memref<36x8xbf16, #tpu.memory_space<vmem>>, %arg4: memref<1x8xf32, #tpu.memory_space<vmem>>, %arg5: memref<1x8xf32, #tpu.memory_space<vmem>>, %arg6: memref<1x8x8x16xf32, #tpu.memory_space<vmem>>) attributes {dimension_semantics = [#tpu.dimension_semantics<parallel>, #tpu.dimension_semantics<parallel>], iteration_bounds = array<i64: 2, 2>, scalar_prefetch = 0 : i64, scratch_operands = 0 : i64, tpu.core_type = #tpu.core_type<tc>, window_params = [{transform_indices = @transform_0, window_bounds = array<i64: 1, 18, 18, 4>}, {pipeline_mode = #tpu.pipeline_mode<synchronous>, transform_indices = @transform_1, window_bounds = array<i64: 36, 8>}, {pipeline_mode = #tpu.pipeline_mode<synchronous>, transform_indices = @transform_2, window_bounds = array<i64: 1, 8>}, {pipeline_mode = #tpu.pipeline_mode<synchronous>, transform_indices = @transform_3, window_bounds = array<i64: 1, 8>}, {transform_indices = @transform_4, window_bounds = array<i64: 1, 8, 8, 16>}]} {
    %c8_i32 = arith.constant 8 : i32
    %0 = arith.muli %arg1, %c8_i32 : i32
    %1 = tpu.assume_multiple %0, 8 : i32
    %c0 = arith.constant 0 : index
    %2 = arith.index_cast %1 : i32 to index
    %c0_0 = arith.constant 0 : index
    %c0_1 = arith.constant 0 : index
    %3 = vector.load %arg2[%c0, %2, %c0_0, %c0_1] : memref<1x18x18x4xbf16, #tpu.memory_space<vmem>>, vector<1x10x18x4xbf16>
    %4 = vector.shape_cast %3 : vector<1x10x18x4xbf16> to vector<10x18x4xbf16>
    %5 = vector.extract_strided_slice %4 {offsets = [0, 0, 0], sizes = [10, 16, 4], strides = [1, 1, 1]} : vector<10x18x4xbf16> to vector<10x16x4xbf16>
    %6 = vector.extract_strided_slice %4 {offsets = [0, 1, 0], sizes = [10, 16, 4], strides = [1, 1, 1]} : vector<10x18x4xbf16> to vector<10x16x4xbf16>
    %7 = vector.extract_strided_slice %4 {offsets = [0, 2, 0], sizes = [10, 16, 4], strides = [1, 1, 1]} : vector<10x18x4xbf16> to vector<10x16x4xbf16>
    %8 = tpu.concatenate %5, %6, %7 in 2 : vector<10x16x4xbf16>, vector<10x16x4xbf16>, vector<10x16x4xbf16> -> vector<10x16x12xbf16>
    %9 = vector.extract_strided_slice %8 {offsets = [0, 0, 0], sizes = [8, 16, 12], strides = [1, 1, 1]} : vector<10x16x12xbf16> to vector<8x16x12xbf16>
    %10 = vector.extract_strided_slice %8 {offsets = [1, 0, 0], sizes = [8, 16, 12], strides = [1, 1, 1]} : vector<10x16x12xbf16> to vector<8x16x12xbf16>
    %11 = vector.extract_strided_slice %8 {offsets = [2, 0, 0], sizes = [8, 16, 12], strides = [1, 1, 1]} : vector<10x16x12xbf16> to vector<8x16x12xbf16>
    %12 = tpu.concatenate %9, %10, %11 in 2 : vector<8x16x12xbf16>, vector<8x16x12xbf16>, vector<8x16x12xbf16> -> vector<8x16x36xbf16>
    %13 = vector.shape_cast %12 : vector<8x16x36xbf16> to vector<128x36xbf16>
    %c0_2 = arith.constant 0 : index
    %c0_3 = arith.constant 0 : index
    %14 = vector.load %arg3[%c0_2, %c0_3] : memref<36x8xbf16, #tpu.memory_space<vmem>>, vector<36x8xbf16>
    %cst = arith.constant dense<0.000000e+00> : vector<128x8xf32>
    %15 = tpu.matmul %13, %14, %cst {dimension_numbers = #tpu.dot_dimension_numbers<[1], [0], [0], [1], [0, 0, 1, 1], [], []>} : vector<128x36xbf16>, vector<36x8xbf16>, vector<128x8xf32> -> vector<128x8xf32>
    %c0_4 = arith.constant 0 : index
    %c0_5 = arith.constant 0 : index
    %16 = vector.load %arg4[%c0_4, %c0_5] : memref<1x8xf32, #tpu.memory_space<vmem>>, vector<1x8xf32>
    %17 = vector.broadcast %16 : vector<1x8xf32> to vector<128x8xf32>
    %18 = arith.mulf %15, %17 : vector<128x8xf32>
    %c0_6 = arith.constant 0 : index
    %c0_7 = arith.constant 0 : index
    %19 = vector.load %arg5[%c0_6, %c0_7] : memref<1x8xf32, #tpu.memory_space<vmem>>, vector<1x8xf32>
    %20 = vector.broadcast %19 : vector<1x8xf32> to vector<128x8xf32>
    %21 = arith.addf %18, %20 : vector<128x8xf32>
    %cst_8 = arith.constant 0.000000e+00 : f32
    %22 = vector.broadcast %cst_8 : f32 to vector<128x8xf32>
    %23 = arith.maximumf %21, %22 : vector<128x8xf32>
    %24 = tpu.transpose %23, [1, 0] : vector<128x8xf32> -> vector<8x128xf32>
    %25 = vector.shape_cast %24 : vector<8x128xf32> to vector<1x8x8x16xf32>
    %c0_9 = arith.constant 0 : index
    %c0_10 = arith.constant 0 : index
    %c0_11 = arith.constant 0 : index
    %c0_12 = arith.constant 0 : index
    %26 = vector.load %arg6[%c0_9, %c0_10, %c0_11, %c0_12] : memref<1x8x8x16xf32, #tpu.memory_space<vmem>>, vector<1x8x8x16xf32>
    tpu.vector_store %arg6[%c0_9, %c0_10, %c0_11, %c0_12], %25 {strides = array<i32>} : memref<1x8x8x16xf32, #tpu.memory_space<vmem>>, vector<1x8x8x16xf32>,
    return
  }
  func.func @transform_0(%arg0: i32, %arg1: i32) -> (i32, i32, i32, i32) {
    %c0_i32 = arith.constant 0 : i32
    %c0_i32_0 = arith.constant 0 : i32
    %c0_i32_1 = arith.constant 0 : i32
    %c0_i32_2 = arith.constant 0 : i32
    return %arg0, %c0_i32, %c0_i32_0, %c0_i32_1 : i32, i32, i32, i32
  }
  func.func @transform_1(%arg0: i32, %arg1: i32) -> (i32, i32) {
    %c0_i32 = arith.constant 0 : i32
    %c0_i32_0 = arith.constant 0 : i32
    %c0_i32_1 = arith.constant 0 : i32
    return %c0_i32, %c0_i32_0 : i32, i32
  }
  func.func @transform_2(%arg0: i32, %arg1: i32) -> (i32, i32) {
    %c0_i32 = arith.constant 0 : i32
    %c0_i32_0 = arith.constant 0 : i32
    %c0_i32_1 = arith.constant 0 : i32
    return %c0_i32, %c0_i32_0 : i32, i32
  }
  func.func @transform_3(%arg0: i32, %arg1: i32) -> (i32, i32) {
    %c0_i32 = arith.constant 0 : i32
    %c0_i32_0 = arith.constant 0 : i32
    %c0_i32_1 = arith.constant 0 : i32
    return %c0_i32, %c0_i32_0 : i32, i32
  }
  func.func @transform_4(%arg0: i32, %arg1: i32) -> (i32, i32, i32, i32) {
    %c0_i32 = arith.constant 0 : i32
    %c0_i32_0 = arith.constant 0 : i32
    %c0_i32_1 = arith.constant 0 : i32
    return %arg0, %c0_i32, %arg1, %c0_i32_0 : i32, i32, i32, i32
  }
}

</mosaic_0001>

<bundles_post_ra>
// kernel: encoder_block.2
= control target key start
LH: loop header
LB: loop body
LE: loop exit
PB: predicated region body
PF: predicated region fallthrough
CT: control target
= control target key end

     0   :  { %s1132_s9 = smov 0   ;;  %s1134_s10 = smov 0   ;;  %s1435_s0 = inlined_call_operand.vmem [shape: bf16[2,18,18,4], index: 0, kind: input, shape index: {}]   ;;  %s1436_s1 = inlined_call_operand.vmem [shape: bf16[36,8], index: 1, kind: input, shape index: {}]   ;;  %s1437_s2 = inlined_call_operand.vmem [shape: f32[2,2,2,8], index: 2, kind: output, shape index: {}]  }
   0x1   :  { %s1136_s11 = smov 0   ;;  %s1138_s12 = smov 0  }
   0x2   :  { %s1140_s13 = smov 0  }
   0x3 LB: > { %s21_s14 = sadd.s32 1, %s1103_s11  ;;  %s24_s15 = sadd.s32 1, %s1107_s12  ;;  %s1111_s13 = sphi %s1140_s13, %s12_s13   ;;  %s1107_s12 = sphi %s1138_s12, %s1441_s12   ;;  %s1103_s11 = sphi %s1136_s11, %s1440_s11   ;;  %s1099_s10 = sphi %s1134_s10, %s1439_s10   ;;  %s1095_s9 = sphi %s1132_s9, %s1438_s9  }
   0x4   : > { %p22_p0 = scmp.ge.s32.totalorder %s21_s14, 2  ;;  %p923_p1 = scmp.ge.s32.totalorder %s1111_s13, 1 }
   0x5   : > { %p126_p2 = scmp.lt.s32.totalorder %s1111_s13, 5 }
   0x6   : > { %s1443_s14 = smov (%p22_p0, %s21_s14), 0  ;;  %s1445_s15 = smov (!%p22_p0, %s24_s15), %s1107_s12 }
   0x7   : > { %p127_p3 = pnand %p923_p1, %p126_p2  ;;  %p26_p4 = scmp.ge.s32.totalorder %s1445_s15, 2 }
   0x8   : > { %p151_p5 = scmp.lt.s32.totalorder (!%p127_p3), %s1099_s10, 1  ;;  %s963_s16 = smul.u32 (!%p127_p3), 96, %s1095_s9 }
   0x9   : > { %s1447_s15 = smov (%p26_p4, %s1445_s15), 0  ;;  %130 = sbr.rel (%p127_p3) target bundleno = 564 (0x234), region = 28 }
   0xa   : > { %s1113_s22 = smov (!%p127_p3), 8   ;;  %s1114_s23 = smov (!%p127_p3), 4  }
   0xb   : > { %s1115_s30 = smov (!%p127_p3), 12   ;;  %s1116_s3 = smov (!%p127_p3), 24  }
   0xc   : > { %p158_p6 = scmp.lt.s32.totalorder (!%p127_p3), %s1095_s9, 1 }
   0xe   : > { %s1449_s10 = smov (!%p151_p5, %s1099_s10), 1  ;;  %vm279_vm0 = vsmask.f32 7424  ;;  %vm420_vm1 = vcmask 1046528   ;;  %vm625_vm2 = vcmask 1041408   ;;  %vm471_vm3 = vcmask 31744  }
   0xf   : > { %s1005_s17 = smul.u32 216, %s1449_s10  ;;  %vm492_vm4 = vcmask 64512   ;;  %vm554_vm5 = vcmask 97280   ;;  %vm571_vm6 = vcmask 195584   ;;  %vm608_vm7 = vcmask 293888   ;;  %s1451_s9 = smov (!%p158_p6, %s1095_s9), 1 }
  0x10   : > { %s925_s4 = sshll.u32 %s1449_s10, 1  ;;  %vm833_vm8 = vcmask 1040384   ;;  %vm835_vm9 = vcmask 58368  }
  0x11   : > { %s155_s20 = scalar_lea.vmem %s1435_s0, %s1005_s17  ;;  %s161_s5 = sadd.s32 %s925_s4, %s1451_s9 }
  0x12   : > { %s1171_s21 = scalar_lea.vmem %s155_s20, %s963_s16  ;;  %s926_s6 = sshll.u32 %s161_s5, 1 }
  0x13   : > { %v1174_v0 = vld [vmem:[%s1171_s21 + $0xc] sm:$0xff]   ;;  %v1051_v1 = vld [vmem:[%s1171_s21 + $0x14] ss:$0 sps:$4 sm:$0x11]   ;;  %v1178_v2 = vld [vmem:[%s1171_s21 + $0x18] sm:$0xff]   ;;  %s163_s16 = scalar_lea.vmem %s1437_s2, %s926_s6 }
  0x14   : > { %v293_v3 = vshrl.u32 %v1174_v0, 16  ;;  %v295_v4 = vshll.u32 %v1174_v0, 16  ;;  %v300_v5 = vshll.u32 %v1051_v1, 16  ;;  %v424_v6 = vrot.slane %v1174_v0, 1  ;;  %v1188_v16 = vld [vmem:[%s1171_s21 + $0x24] sm:$0xff]   ;;  %v1196_v25 = vld [vmem:[%s1171_s21 + $0x30] sm:$0xff]  }
  0x15   : > { %v425_v7 = vrot.slane %v1051_v1, 1  ;;  %v1053_v8 = vld [vmem:[%s1171_s21 + $0x20] ss:$0 sps:$4 sm:$0x11]   ;;  %v305_v9 = vshrl.u32 %v1178_v2, 16  ;;  %v307_v10 = vshll.u32 %v1178_v2, 16 }
  0x16   : > { %v297_v11 = vrot.slane %v295_v4, 1  ;;  %v302_v12 = vrot.slane %v300_v5, 1  ;;  %v312_v15 = vshll.u32 %v1053_v8, 16  ;;  %v1055_v17 = vld [vmem:[%s1171_s21 + $0x2c] ss:$0 sps:$4 sm:$0x11]  }
  0x17   : > { %v426_v13 = vsel %vm420_vm1, %v424_v6, %v425_v7  ;;  %v309_v14 = vrot.slane %v307_v10, 1  ;;  %v427_v19 = vrot.slane %v1178_v2, 1  ;;  %v428_v20 = vrot.slane %v1053_v8, 1  ;;  %v1057_v29 = vld [vmem:[%s1171_s21 + $0x38] ss:$0 sps:$4 sm:$0x11]  }
  0x18   : > { %v298_v18 = vor.u32 %v297_v11, %v293_v3  ;;  %453 = vrot.lane.b32.xlu1 %v426_v13, %s1113_s22  ;;  %v314_v22 = vrot.slane %v312_v15, 1  ;;  %v317_v23 = vshrl.u32 %v1188_v16, 16  ;;  %v319_v24 = vshll.u32 %v1188_v16, 16  ;;  %v1202_v30 = vld [vmem:[%s1171_s21 + $0x3c] sm:$0xff]   ;;  %v1208_v35 = vld [vmem:[%s1171_s21 + $0x48] sm:$0xff]   ;;  %v1217_v47 = vld [vmem:[%s1171_s21 + $0x54] sm:$0xff]  }
  0x19   : > { %v310_v21 = vor.u32 %v309_v14, %v305_v9  ;;  %v324_v27 = vshll.u32 %v1055_v17, 16  ;;  %v430_v28 = vrot.slane %v1188_v16, 1  ;;  %v431_v33 = vrot.slane %v1055_v17, 1  ;;  %v1059_v41 = vld [vmem:[%s1171_s21 + $0x44] ss:$0 sps:$4 sm:$0x11]  }
  0x1a   : > { %v303_v26 = vsel %vm279_vm0, %v298_v18, %v302_v12  ;;  %v321_v32 = vrot.slane %v319_v24, 1  ;;  %v329_v34 = vshrl.u32 %v1196_v25, 16  ;;  %v331_v37 = vshll.u32 %v1196_v25, 16  ;;  %v1061_v51 = vld [vmem:[%s1171_s21 + $0x50] ss:$0 sps:$4 sm:$0x11]  }
  0x1b   : > { %402 = vrot.lane.b32.xlu0 %v303_v26, %s1114_s23  ;;  %v315_v31 = vsel %vm279_vm0, %v310_v21, %v314_v22  ;;  %v326_v36 = vrot.slane %v324_v27, 1  ;;  %v336_v38 = vshll.u32 %v1057_v29, 16  ;;  %v341_v39 = vshrl.u32 %v1202_v30, 16  ;;  %v1063_v60 = vld [vmem:[%s1171_s21 + $0x5c] ss:$0 sps:$4 sm:$0x11]  }
  0x1c   : > { %v322_v40 = vor.u32 %v321_v32, %v317_v23  ;;  %v343_v42 = vshll.u32 %v1202_v30, 16  ;;  %v333_v43 = vrot.slane %v331_v37, 1  ;;  %v348_v46 = vshll.u32 %v1059_v41, 16  ;;  %v1233_v4 = vld [vmem:[%s1171_s21 + $0x60] sm:$0xff]   ;;  %v1238_v9 = vld [vmem:[%s1171_s21 + $0x6c] sm:$0xff]  }
  0x1d   : > { %v429_v48 = vsel %vm420_vm1, %v427_v19, %v428_v20  ;;  %v338_v50 = vrot.slane %v336_v38, 1  ;;  %v432_v52 = vsel %vm420_vm1, %v430_v28, %v431_v33  ;;  %v355_v55 = vshll.u32 %v1208_v35, 16  ;;  %v1065_v13 = vld [vmem:[%s1171_s21 + $0x68] ss:$0 sps:$4 sm:$0x11]  }
  0x1e   : > { %v327_v44 = vsel %vm279_vm0, %v322_v40, %v326_v36  ;;  %v345_v45 = vrot.slane %v343_v42, 1  ;;  %v334_v49 = vor.u32 %v333_v43, %v329_v34  ;;  %v350_v54 = vrot.slane %v348_v46, 1  ;;  %v1067_v19 = vld [vmem:[%s1171_s21 + $0x74] ss:$0 sps:$4 sm:$0x11]  }
  0x1f   : > { %404 = vrot.lane.b32.xlu0 %v315_v31, %s1114_s23  ;;  %406 = vrot.lane.b32.xlu1 %v327_v44, %s1114_s23  ;;  %v433_v56 = vrot.slane %v1196_v25, 1  ;;  %v434_v57 = vrot.slane %v1057_v29, 1  ;;  %v436_v58 = vrot.slane %v1202_v30, 1  ;;  %v360_v59 = vshll.u32 %v1061_v51, 16  ;;  %v1255_v31 = vld [vmem:[%s1171_s21] sm:$0xff]  }
  0x20   : > { %v346_v53 = vor.u32 %v345_v45, %v341_v39  ;;  %v367_v61 = vshll.u32 %v1217_v47, 16  ;;  %v339_v62 = vsel %vm279_vm0, %v334_v49, %v338_v50  ;;  %v437_v63 = vrot.slane %v1059_v41, 1  ;;  %v1069_v40 = vld [vmem:[%s1171_s21 + $0x8] ss:$0 sps:$4 sm:$0x11]  }
  0x21   : > { %v353_v1 = vshrl.u32 %v1208_v35, 16  ;;  %v357_v3 = vrot.slane %v355_v55, 1  ;;  %v365_v6 = vshrl.u32 %v1217_v47, 16  ;;  %v372_v8 = vshll.u32 %v1063_v60, 16 }
  0x22   : > { %v351_v5 = vsel %vm279_vm0, %v346_v53, %v350_v54  ;;  %v369_v7 = vrot.slane %v367_v61, 1  ;;  %v362_v10 = vrot.slane %v360_v59, 1  ;;  %v435_v11 = vsel %vm420_vm1, %v433_v56, %v434_v57 }
  0x23   : > { %455 = vrot.lane.b32.xlu0 %v429_v48, %s1113_s22  ;;  %457 = vrot.lane.b32.xlu1 %v432_v52, %s1113_s22  ;;  %v358_v12 = vor.u32 %v357_v3, %v353_v1  ;;  %v379_v14 = vshll.u32 %v1233_v4, 16  ;;  %v438_v15 = vsel %vm420_vm1, %v436_v58, %v437_v63  ;;  %v374_v18 = vrot.slane %v372_v8, 1  ;;  %v1070_v63 = vld [vmem:[%s1436_s1 + $0x10] ss:$0 sps:$4 sm:$0x33]   ;;  %v1071_v3 = vld [vmem:[%s1436_s1 + $0x8] sm:$0xff]  }
  0x24   : > { %v370_v17 = vor.u32 %v369_v7, %v365_v6  ;;  %v391_v20 = vshll.u32 %v1238_v9, 16  ;;  %v439_v21 = vrot.slane %v1208_v35, 1  ;;  %v440_v22 = vrot.slane %v1061_v51, 1  ;;  %1003 = vmatprep.subr.msk.bf16.mxu0 %vm625_vm2, %v1070_v63  ;;  %1004 = vmatprep.subr.msk.bf16.mxu1 %vm625_vm2, %v1070_v63 }
  0x25   : > { %v442_v23 = vrot.slane %v1217_v47, 1  ;;  %v377_v24 = vshrl.u32 %v1233_v4, 16  ;;  %v363_v26 = vsel %vm279_vm0, %v358_v12, %v362_v10  ;;  %v443_v27 = vrot.slane %v1063_v60, 1 }
  0x26   : > { %v381_v28 = vrot.slane %v379_v14, 1  ;;  %v384_v29 = vshll.u32 %v1065_v13, 16  ;;  %v375_v32 = vsel %vm279_vm0, %v370_v17, %v374_v18  ;;  %v389_v33 = vshrl.u32 %v1238_v9, 16 }
  0x27   : > { %408 = vrot.lane.b32.xlu0 %v339_v62, %s1114_s23  ;;  %410 = vrot.lane.b32.xlu1 %v351_v5, %s1114_s23  ;;  %v393_v34 = vrot.slane %v391_v20, 1  ;;  %v396_v36 = vshll.u32 %v1067_v19, 16  ;;  %v441_v37 = vsel %vm420_vm1, %v439_v21, %v440_v22  ;;  %v283_v41 = vshll.u32 %v1255_v31, 16  ;;  %v1072_v5 = vld [vmem:[%s1436_s1] sm:$0xff]  }
  0x28   : > { %v382_v38 = vor.u32 %v381_v28, %v377_v24  ;;  %v386_v39 = vrot.slane %v384_v29, 1  ;;  %v444_v42 = vsel %vm420_vm1, %v442_v23, %v443_v27  ;;  %v445_v45 = vrot.slane %v1233_v4, 1 }
  0x29   : > { %v394_v43 = vor.u32 %v393_v34, %v389_v33  ;;  %v398_v44 = vrot.slane %v396_v36, 1  ;;  %v446_v46 = vrot.slane %v1065_v13, 1  ;;  %v281_v49 = vshrl.u32 %v1255_v31, 16 }
  0x2a   : > { %v387_v48 = vsel %vm279_vm0, %v382_v38, %v386_v39  ;;  %v285_v50 = vrot.slane %v283_v41, 1  ;;  %v288_v51 = vshll.u32 %v1069_v40, 16  ;;  %v448_v53 = vrot.slane %v1238_v9, 1 }
  0x2b   : > { %459 = vrot.lane.b32.xlu0 %v435_v11, %s1113_s22  ;;  %461 = vrot.lane.b32.xlu1 %v438_v15, %s1113_s22  ;;  %v399_v52 = vsel %vm279_vm0, %v394_v43, %v398_v44  ;;  %v449_v54 = vrot.slane %v1067_v19, 1  ;;  %v447_v55 = vsel %vm420_vm1, %v445_v45, %v446_v46  ;;  %v421_v59 = vrot.slane %v1255_v31, 1 }
  0x2c   : > { %v286_v56 = vor.u32 %v285_v50, %v281_v49  ;;  %v290_v57 = vrot.slane %v288_v51, 1  ;;  %v422_v60 = vrot.slane %v1069_v40, 1  ;;  %v627_v1 = vsel %vm625_vm2, %v1070_v63, 0 }
  0x2d   : > { %v450_v58 = vsel %vm420_vm1, %v448_v53, %v449_v54  ;;  %976 = vmatpush3.bf16.msra.mxu0 %v627_v1  ;;  %1000 = vmatpush3.bf16.msra.mxu1 %v627_v1 }
  0x2e   : > { %v291_v61 = vsel %vm279_vm0, %v286_v56, %v290_v57  ;;  %v423_v62 = vsel %vm420_vm1, %v421_v59, %v422_v60  ;;  %977 = vmatprep.subr.bf16.mxu0 %v1071_v3  ;;  %998 = vmatprep.subr.bf16.mxu1 %v1071_v3 }
  0x2f   : > { %412 = vrot.lane.b32.xlu0 %v363_v26, %s1114_s23  ;;  %414 = vrot.lane.b32.xlu1 %v375_v32, %s1114_s23 }
  0x31   : > { %978 = vmatpush3.bf16.msra.mxu0 %v1071_v3  ;;  %1001 = vmatpush3.bf16.msra.mxu1 %v1071_v3 }
  0x32   : > { %979 = vmatprep.subr.bf16.mxu0 %v1072_v5  ;;  %999 = vmatprep.subr.bf16.mxu1 %v1072_v5 }
  0x33   : > { %463 = vrot.lane.b32.xlu0 %v441_v37, %s1113_s22  ;;  %465 = vrot.lane.b32.xlu1 %v444_v42, %s1113_s22 }
  0x35   : > { %980 = vmatpush3.bf16.msra.mxu0 %v1072_v5  ;;  %1002 = vmatpush3.bf16.msra.mxu1 %v1072_v5 }
  0x37   : > { %416 = vrot.lane.b32.xlu0 %v387_v48, %s1114_s23  ;;  %418 = vrot.lane.b32.xlu1 %v399_v52, %s1114_s23 }
  0x3b   : > { %467 = vrot.lane.b32.xlu0 %v447_v55, %s1113_s22  ;;  %469 = vrot.lane.b32.xlu1 %v450_v58, %s1113_s22 }
  0x3f   : > { %400 = vrot.lane.b32.xlu0 %v291_v61, %s1114_s23  ;;  %451 = vrot.lane.b32.xlu1 %v423_v62, %s1113_s22 }
  0x8a   : > { %v454_v6 = vpop.permute.xlu1 %453 }
  0x8d   : > { %v403_v7 = vpop.permute.xlu0 %402 }
  0x8e   : > { %v475_v8 = vsel %vm471_vm3, %v1174_v0, %v403_v7 }
  0x8f   : > { %v1295_v10 = vsel %vm492_vm4, %v475_v8, %v454_v6 }
  0x90   : > { %521 = vrot.lane.b32.xlu0 %v1295_v10, %s1115_s30 }
  0x91   : > { %v405_v11 = vpop.permute.xlu0 %404  ;;  %v407_v12 = vpop.permute.xlu1 %406 }
  0x92   : > { %v477_v13 = vsel %vm471_vm3, %v1178_v2, %v405_v11  ;;  %v479_v18 = vsel %vm471_vm3, %v1188_v16, %v407_v12 }
  0x95   : > { %v456_v14 = vpop.permute.xlu0 %455  ;;  %v458_v15 = vpop.permute.xlu1 %457 }
  0x96   : > { %v498_v17 = vsel %vm492_vm4, %v477_v13, %v456_v14  ;;  %v500_v20 = vsel %vm492_vm4, %v479_v18, %v458_v15 }
  0x97   : > { %523 = vrot.lane.b32.xlu1 %v498_v17, %s1115_s30  ;;  %538 = vrot.lane.b32.xlu0 %v498_v17, %s1116_s3 }
  0x99   : > { %v409_v0 = vpop.permute.xlu0 %408  ;;  %v411_v19 = vpop.permute.xlu1 %410 }
  0x9a   : > { %v481_v2 = vsel %vm471_vm3, %v1196_v25, %v409_v0  ;;  %v483_v23 = vsel %vm471_vm3, %v1202_v30, %v411_v19 }
  0x9b   : > { %540 = vrot.lane.b32.xlu1 %v500_v20, %s1116_s3  ;;  %525 = vrot.lane.b32.xlu0 %v500_v20, %s1115_s30 }
  0x9d   : > { %v460_v21 = vpop.permute.xlu0 %459  ;;  %v462_v22 = vpop.permute.xlu1 %461 }
  0x9e   : > { %v502_v16 = vsel %vm492_vm4, %v481_v2, %v460_v21  ;;  %v504_v27 = vsel %vm492_vm4, %v483_v23, %v462_v22 }
  0x9f   : > { %527 = vrot.lane.b32.xlu1 %v502_v16, %s1115_s30  ;;  %542 = vrot.lane.b32.xlu0 %v502_v16, %s1116_s3 }
  0xa1   : > { %v413_v24 = vpop.permute.xlu0 %412  ;;  %v415_v26 = vpop.permute.xlu1 %414 }
  0xa2   : > { %v485_v25 = vsel %vm471_vm3, %v1208_v35, %v413_v24  ;;  %v487_v30 = vsel %vm471_vm3, %v1217_v47, %v415_v26 }
  0xa3   : > { %544 = vrot.lane.b32.xlu1 %v504_v27, %s1116_s3  ;;  %529 = vrot.lane.b32.xlu0 %v504_v27, %s1115_s30 }
  0xa5   : > { %v464_v28 = vpop.permute.xlu0 %463  ;;  %v466_v29 = vpop.permute.xlu1 %465 }
  0xa6   : > { %v506_v32 = vsel %vm492_vm4, %v485_v25, %v464_v28  ;;  %v508_v36 = vsel %vm492_vm4, %v487_v30, %v466_v29 }
  0xa7   : > { %531 = vrot.lane.b32.xlu1 %v506_v32, %s1115_s30  ;;  %546 = vrot.lane.b32.xlu0 %v506_v32, %s1116_s3 }
  0xa9   : > { %v417_v33 = vpop.permute.xlu0 %416  ;;  %v419_v34 = vpop.permute.xlu1 %418 }
  0xaa   : > { %v489_v35 = vsel %vm471_vm3, %v1233_v4, %v417_v33  ;;  %v491_v47 = vsel %vm471_vm3, %v1238_v9, %v419_v34 }
  0xab   : > { %548 = vrot.lane.b32.xlu1 %v508_v36, %s1116_s3  ;;  %533 = vrot.lane.b32.xlu0 %v508_v36, %s1115_s30 }
  0xad   : > { %v468_v37 = vpop.permute.xlu0 %467  ;;  %v470_v39 = vpop.permute.xlu1 %469 }
  0xae   : > { %v510_v38 = vsel %vm492_vm4, %v489_v35, %v468_v37  ;;  %v512_v40 = vsel %vm492_vm4, %v491_v47, %v470_v39 }
  0xaf   : > { %535 = vrot.lane.b32.xlu1 %v510_v38, %s1115_s30  ;;  %550 = vrot.lane.b32.xlu0 %v510_v38, %s1116_s3 }
  0xb1   : > { %v401_v41 = vpop.permute.xlu0 %400  ;;  %v452_v4 = vpop.permute.xlu1 %451 }
  0xb2   : > { %v473_v42 = vsel %vm471_vm3, %v1255_v31, %v401_v41 }
  0xb3   : > { %552 = vrot.lane.b32.xlu1 %v512_v40, %s1116_s3  ;;  %v494_v44 = vsel %vm492_vm4, %v473_v42, %v452_v4 }
 0x102   : > { %v522_v43 = vpop.permute.xlu0 %521 }
 0x103   : > { %v556_v9 = vsel %vm554_vm5, %v494_v44, %v522_v43 }
 0x109   : > { %v524_v45 = vpop.permute.xlu1 %523  ;;  %v539_v46 = vpop.permute.xlu0 %538 }
 0x10a   : > { %v573_v48 = vsel %vm571_vm6, %v556_v9, %v539_v46  ;;  %v558_v49 = vsel %vm554_vm5, %v1295_v10, %v524_v45 }
 0x10b   : > { %981 = vmatprep.mubr.msk.bf16.mxu0 %vm608_vm7, %v573_v48 }
 0x10d   : > { %v541_v50 = vpop.permute.xlu1 %540  ;;  %v526_v31 = vpop.permute.xlu0 %525 }
 0x10e   : > { %v575_v51 = vsel %vm571_vm6, %v558_v49, %v541_v50  ;;  %v560_v52 = vsel %vm554_vm5, %v498_v17, %v526_v31 }
 0x10f   : > { %982 = vmatmul.mubr.msk.bf16.vlgmr.msra.gmra.mxu0 %vm608_vm7, %v575_v51 }
 0x111   : > { %v528_v53 = vpop.permute.xlu1 %527  ;;  %v543_v54 = vpop.permute.xlu0 %542 }
 0x112   : > { %v577_v55 = vsel %vm571_vm6, %v560_v52, %v543_v54  ;;  %v562_v56 = vsel %vm554_vm5, %v500_v20, %v528_v53 }
 0x113   : > { %985 = vmatprep.mubr.msk.bf16.mxu0 %vm608_vm7, %v577_v55 }
 0x115   : > { %v545_v57 = vpop.permute.xlu1 %544  ;;  %v530_v58 = vpop.permute.xlu0 %529 }
 0x116   : > { %v579_v59 = vsel %vm571_vm6, %v562_v56, %v545_v57  ;;  %v564_v60 = vsel %vm554_vm5, %v502_v16, %v530_v58 }
 0x117   : > { %986 = vmatmul.mubr.msk.bf16.gmra.mxu0 %vm608_vm7, %v579_v59 }
 0x119   : > { %v532_v61 = vpop.permute.xlu1 %531  ;;  %v547_v62 = vpop.permute.xlu0 %546 }
 0x11a   : > { %v581_v63 = vsel %vm571_vm6, %v564_v60, %v547_v62  ;;  %v566_v1 = vsel %vm554_vm5, %v504_v27, %v532_v61 }
 0x11b   : > { %989 = vmatprep.mubr.msk.bf16.mxu1 %vm608_vm7, %v581_v63 }
 0x11d   : > { %v549_v3 = vpop.permute.xlu1 %548  ;;  %v534_v5 = vpop.permute.xlu0 %533 }
 0x11e   : > { %v583_v6 = vsel %vm571_vm6, %v566_v1, %v549_v3  ;;  %v568_v7 = vsel %vm554_vm5, %v506_v32, %v534_v5 }
 0x11f   : > { %990 = vmatmul.mubr.msk.bf16.vlgmr.msra.gmra.mxu1 %vm608_vm7, %v583_v6 }
 0x121   : > { %v536_v8 = vpop.permute.xlu1 %535  ;;  %v551_v10 = vpop.permute.xlu0 %550 }
 0x122   : > { %v585_v11 = vsel %vm571_vm6, %v568_v7, %v551_v10  ;;  %v570_v12 = vsel %vm554_vm5, %v508_v36, %v536_v8 }
 0x123   : > { %993 = vmatprep.mubr.msk.bf16.mxu1 %vm608_vm7, %v585_v11 }
 0x125   : > { %v553_v13 = vpop.permute.xlu1 %552 }
 0x126   : > { %v587_v14 = vsel %vm571_vm6, %v570_v12, %v553_v13 }
 0x127   : > { %994 = vmatmul.mubr.msk.bf16.gmra.mxu1 %vm608_vm7, %v587_v14 }
 0x1cf   : > { %v983_v15 = vpop.f32.mrf.mxu0 }
 0x1d0   : > { %v729_v22 = vsel %vm492_vm4, %v983_v15, 0.0 }
 0x1d1   : > { %v663_v17 = vpop.f32.mrf.mxu0 }
 0x1d2   : > { %v726_v19 = vsel %vm492_vm4, %v663_v17, 0.0 }
 0x1d3   : > { %v984_v18 = vpop.f32.mrf.mxu0 }
 0x1d4   : > { %v731_v24 = vsel %vm492_vm4, %v984_v18, 0.0 }
 0x1d5   : > { %v666_v0 = vpop.f32.mrf.mxu0 }
 0x1d6   : > { %v727_v20 = vsel %vm492_vm4, %v666_v0, 0.0 }
 0x1d7   : > { %v728_v2 = vadd.f32 %v727_v20, %v726_v19  ;;  %v987_v21 = vpop.f32.mrf.mxu0 }
 0x1d8   : > { %v737_v34 = vsel %vm492_vm4, %v987_v21, 0.0 }
 0x1d9   : > { %v730_v16 = vadd.f32 %v729_v22, %v728_v2  ;;  %v679_v23 = vpop.f32.mrf.mxu0 }
 0x1da   : > { %v733_v25 = vsel %vm492_vm4, %v679_v23, 0.0 }
 0x1db   : > { %v732_v26 = vadd.f32 %v731_v24, %v730_v16  ;;  %v988_v27 = vpop.f32.mrf.mxu0 }
 0x1dc   : > { %v739_v37 = vsel %vm492_vm4, %v988_v27, 0.0 }
 0x1dd   : > { %v734_v28 = vadd.f32 %v733_v25, %v732_v26  ;;  %v682_v29 = vpop.f32.mrf.mxu0 }
 0x1de   : > { %v735_v32 = vsel %vm492_vm4, %v682_v29, 0.0 }
 0x1df   : > { %v736_v30 = vadd.f32 %v735_v32, %v734_v28  ;;  %v1372_v33 = vpop.f32.mrf.mxu1 }
 0x1e0   : > { %v745_v44 = vsel %vm492_vm4, %v1372_v33, 0.0 }
 0x1e1   : > { %v738_v36 = vadd.f32 %v737_v34, %v736_v30  ;;  %v695_v35 = vpop.f32.mrf.mxu1 }
 0x1e2   : > { %v741_v39 = vsel %vm492_vm4, %v695_v35, 0.0 }
 0x1e3   : > { %v740_v38 = vadd.f32 %v739_v37, %v738_v36  ;;  %v992_v47 = vpop.f32.mrf.mxu1 }
 0x1e4   : > { %v747_v46 = vsel %vm492_vm4, %v992_v47, 0.0 }
 0x1e5   : > { %v742_v40 = vadd.f32 %v741_v39, %v740_v38  ;;  %v698_v41 = vpop.f32.mrf.mxu1 }
 0x1e6   : > { %v743_v42 = vsel %vm492_vm4, %v698_v41, 0.0 }
 0x1e7   : > { %v744_v4 = vadd.f32 %v743_v42, %v742_v40  ;;  %v1378_v43 = vpop.f32.mrf.mxu1 }
 0x1e8   : > { %v753_v54 = vsel %vm492_vm4, %v1378_v43, 0.0 }
 0x1e9   : > { %v746_v9 = vadd.f32 %v745_v44, %v744_v4  ;;  %v711_v45 = vpop.f32.mrf.mxu1 }
 0x1ea   : > { %v749_v50 = vsel %vm492_vm4, %v711_v45, 0.0 }
 0x1eb   : > { %v748_v48 = vadd.f32 %v747_v46, %v746_v9  ;;  %v1383_v49 = vpop.f32.mrf.mxu1 }
 0x1ec   : > { %v755_v56 = vsel %vm492_vm4, %v1383_v49, 0.0 }
 0x1ed   : > { %v750_v31 = vadd.f32 %v749_v50, %v748_v48  ;;  %v714_v51 = vpop.f32.mrf.mxu1 }
 0x1ee   : > { %v751_v52 = vsel %vm492_vm4, %v714_v51, 0.0 }
 0x1ef   : > { %v752_v53 = vadd.f32 %v751_v52, %v750_v31 }
 0x1f1   : > { %v754_v55 = vadd.f32 %v753_v54, %v752_v53 }
 0x1f3   : > { %v756_v57 = vadd.f32 %v755_v56, %v754_v55 }
 0x1f5   : > { %v757_v58 = vrot.slane %v756_v57, 4 }
 0x1f7   : > { %v758_v59 = vadd.f32 %v757_v58, %v756_v57 }
 0x1f9   : > { %v759_v60 = vrot.slane %v758_v59, 2 }
 0x1fb   : > { %v760_v61 = vadd.f32 %v759_v60, %v758_v59 }
 0x1fd   : > { %v761_v62 = vrot.slane %v760_v61, 1 }
 0x1ff   : > { %v1391_v63 = vadd.f32 %v761_v62, %v760_v61 }
 0x201   : > { %v763_v1 = vmul.f32 0.0078125, %v1391_v63 }
 0x203   : > { %v764_v3 = vsub.f32 %v663_v17, %v763_v1  ;;  %v765_v5 = vsub.f32 %v666_v0, %v763_v1  ;;  %v766_v6 = vsub.f32 %v983_v15, %v763_v1  ;;  %v767_v7 = vsub.f32 %v984_v18, %v763_v1 }
 0x204   : > { %v768_v11 = vsub.f32 %v679_v23, %v763_v1  ;;  %v769_v13 = vsub.f32 %v682_v29, %v763_v1  ;;  %v770_v22 = vsub.f32 %v987_v21, %v763_v1  ;;  %v771_v17 = vsub.f32 %v988_v27, %v763_v1 }
 0x205   : > { %v780_v8 = vmul.f32 %v764_v3, %v764_v3  ;;  %v781_v10 = vmul.f32 %v765_v5, %v765_v5  ;;  %v782_v12 = vmul.f32 %v766_v6, %v766_v6  ;;  %v783_v14 = vmul.f32 %v767_v7, %v767_v7 }
 0x206   : > { %v784_v16 = vmul.f32 %v768_v11, %v768_v11  ;;  %v785_v0 = vmul.f32 %v769_v13, %v769_v13  ;;  %v772_v25 = vsub.f32 %v695_v35, %v763_v1  ;;  %v786_v23 = vmul.f32 %v770_v22, %v770_v22 }
 0x207   : > { %v796_v19 = vsel %vm492_vm4, %v780_v8, 0.0  ;;  %v797_v20 = vsel %vm492_vm4, %v781_v10, 0.0  ;;  %v799_v24 = vsel %vm492_vm4, %v782_v12, 0.0  ;;  %v801_v15 = vsel %vm492_vm4, %v783_v14, 0.0 }
 0x208   : > { %v798_v2 = vadd.f32 %v797_v20, %v796_v19  ;;  %v803_v28 = vsel %vm492_vm4, %v784_v16, 0.0  ;;  %v773_v32 = vsub.f32 %v698_v41, %v763_v1  ;;  %v787_v30 = vmul.f32 %v771_v17, %v771_v17 }
 0x209   : > { %v805_v34 = vsel %vm492_vm4, %v785_v0, 0.0  ;;  %v774_v21 = vsub.f32 %v1372_v33, %v763_v1  ;;  %v788_v37 = vmul.f32 %v772_v25, %v772_v25  ;;  %v807_v38 = vsel %vm492_vm4, %v786_v23, 0.0 }
 0x20a   : > { %v800_v26 = vadd.f32 %v799_v24, %v798_v2  ;;  %v775_v39 = vsub.f32 %v992_v47, %v763_v1  ;;  %v789_v40 = vmul.f32 %v773_v32, %v773_v32  ;;  %v809_v42 = vsel %vm492_vm4, %v787_v30, 0.0 }
 0x20b   : > { %v776_v4 = vsub.f32 %v711_v45, %v763_v1  ;;  %v790_v44 = vmul.f32 %v774_v21, %v774_v21  ;;  %v811_v9 = vsel %vm492_vm4, %v788_v37, 0.0  ;;  %v777_v46 = vsub.f32 %v714_v51, %v763_v1 }
 0x20c   : > { %v802_v18 = vadd.f32 %v801_v15, %v800_v26  ;;  %v791_v48 = vmul.f32 %v775_v39, %v775_v39  ;;  %v813_v50 = vsel %vm492_vm4, %v789_v40, 0.0  ;;  %v778_v33 = vsub.f32 %v1378_v43, %v763_v1 }
 0x20d   : > { %v792_v52 = vmul.f32 %v776_v4, %v776_v4  ;;  %v815_v47 = vsel %vm492_vm4, %v790_v44, 0.0  ;;  %v779_v54 = vsub.f32 %v1383_v49, %v763_v1  ;;  %v793_v45 = vmul.f32 %v777_v46, %v777_v46 }
 0x20e   : > { %v804_v29 = vadd.f32 %v803_v28, %v802_v18  ;;  %v817_v55 = vsel %vm492_vm4, %v791_v48, 0.0  ;;  %v794_v51 = vmul.f32 %v778_v33, %v778_v33 }
 0x20f   : > { %v819_v57 = vsel %vm492_vm4, %v792_v52, 0.0  ;;  %v795_v59 = vmul.f32 %v779_v54, %v779_v54  ;;  %v821_v60 = vsel %vm492_vm4, %v793_v45, 0.0 }
 0x210   : > { %v806_v36 = vadd.f32 %v805_v34, %v804_v29  ;;  %v823_v61 = vsel %vm492_vm4, %v794_v51, 0.0 }
 0x211   : > { %v825_v3 = vsel %vm492_vm4, %v795_v59, 0.0 }
 0x212   : > { %v808_v27 = vadd.f32 %v807_v38, %v806_v36 }
 0x214   : > { %v810_v35 = vadd.f32 %v809_v42, %v808_v27 }
 0x216   : > { %v812_v41 = vadd.f32 %v811_v9, %v810_v35 }
 0x218   : > { %v814_v31 = vadd.f32 %v813_v50, %v812_v41 }
 0x21a   : > { %v816_v53 = vadd.f32 %v815_v47, %v814_v31 }
 0x21c   : > { %v818_v56 = vadd.f32 %v817_v55, %v816_v53 }
 0x21e   : > { %v820_v58 = vadd.f32 %v819_v57, %v818_v56 }
 0x220   : > { %v822_v43 = vadd.f32 %v821_v60, %v820_v58 }
 0x222   : > { %v824_v62 = vadd.f32 %v823_v61, %v822_v43 }
 0x224   : > { %v826_v49 = vadd.f32 %v825_v3, %v824_v62 }
 0x226   : > { %v827_v1 = vrot.slane %v826_v49, 4 }
 0x228   : > { %v828_v5 = vadd.f32 %v827_v1, %v826_v49 }
 0x22a   : > { %v829_v6 = vrot.slane %v828_v5, 2 }
 0x22c   : > { %v830_v7 = vadd.f32 %v829_v6, %v828_v5 }
 0x22e   : > { %v831_v8 = vrot.slane %v830_v7, 1 }
 0x230   : > { %v832_v10 = vadd.f32 %v831_v8, %v830_v7 }
 0x232   : > { %v834_v11 = vsel %vm833_vm8, %v1391_v63, %v832_v10 }
 0x233   : > { %836 = vst.msk [vmem:[%s163_s16] sm:$0x3] %vm835_vm9, %v834_v11 }
 0x234 PF: > { %s12_s13 = sadd.s32 1, %s1111_s13   ;;  %s1438_s9 = smov %s1103_s11 }
 0x235   : > { %p9_p7 = scmp.ge.s32.totalorder %s12_s13, 6   ;;  %s1439_s10 = smov %s1107_s12 }
 0x236   : > { %s1440_s11 = smov %s1443_s14  ;;  %s1441_s12 = smov %s1447_s15 }
 0x237   :  { %11 = sbr.rel (!%p9_p7) target bundleno = 3 (0x3), region = 59 }

// kernel: encoder_block.3
= control target key start
LH: loop header
LB: loop body
LE: loop exit
PB: predicated region body
PF: predicated region fallthrough
CT: control target
= control target key end

     0   :  { %9 = vsyncpa [#allocation3], 0  ;;  %s1848_s0 = inlined_call_operand.vmem [shape: bf16[2,18,18,4], index: 0, kind: input, shape index: {}]   ;;  %s1849_s1 = inlined_call_operand.vmem [shape: bf16[36,8], index: 1, kind: input, shape index: {}]   ;;  %s1850_s2 = inlined_call_operand.vmem [shape: f32[1,8], index: 2, kind: input, shape index: {}]   ;;  %s1851_s3 = inlined_call_operand.vmem [shape: f32[1,8], index: 3, kind: input, shape index: {}]   ;;  %s1852_s4 = inlined_call_operand.hbm [shape: f32[2,8,16,16], index: 4, kind: output, shape index: {}]  }
   0x1   :  { %11 = vsyncpa [#allocation3 + $0x1], 0  ;;  %s1460_s15 = smov 0   ;;  %s1462_s16 = smov 0  }
   0x2   :  { %s1464_s17 = smov 0   ;;  %s1466_s18 = smov 0  }
   0x3   :  { %s1468_s19 = smov 0   ;;  %s1470_s20 = smov 0  }
   0x4   :  { %s1472_s21 = smov 0   ;;  %s1474_s22 = smov 0  }
   0x5 LB: > { %s1125_s23 = sadd.s32 4294967295, %s1417_s22   ;;  %s1126_s24 = sadd.s32 4294967294, %s1417_s22   ;;  %s1417_s22 = sphi %s1474_s22, %s17_s22   ;;  %s1413_s21 = sphi %s1472_s21, %s1861_s21   ;;  %s1409_s20 = sphi %s1470_s20, %s1860_s20   ;;  %s1405_s19 = sphi %s1468_s19, %s1859_s19   ;;  %s1401_s18 = sphi %s1466_s18, %s1858_s18   ;;  %s1397_s17 = sphi %s1464_s17, %s1857_s17   ;;  %s1393_s16 = sphi %s1462_s16, %s1856_s16   ;;  %s1389_s15 = sphi %s1460_s15, %s1855_s15  }
   0x6   : > { %s26_s25 = sadd.s32 1, %s1409_s20  ;;  %s29_s26 = sadd.s32 1, %s1413_s21 }
   0x7   : > { %p27_p0 = scmp.ge.s32.totalorder %s26_s25, 2  ;;  %p137_p1 = scmp.ne.s32.totalorder %s1397_s17, %s1393_s16 }
   0x8   : > { %p138_p2 = scmp.eq.s32.totalorder %s1125_s23, 3  ;;  %p143_p5 = scmp.ne.s32.totalorder %s1393_s16, %s1389_s15 }
   0x9   : > { %s1863_s25 = smov (%p27_p0, %s26_s25), 0  ;;  %s1865_s26 = smov (!%p27_p0, %s29_s26), %s1413_s21 }
   0xa   : > { %s123_s27 = ssub.s32 %s1409_s20, %s1863_s25  ;;  %p1511_p3 = por %p138_p2, %p137_p1 }
   0xb   : > { %p31_p4 = scmp.ge.s32.totalorder %s1865_s26, 2  ;;  %p144_p6 = scmp.eq.s32.totalorder %s1126_s24, 3 }
   0xc   : > { %p1129_p7 = scmp.ge.s32.totalorder %s1417_s22, 1  ;;  %p179_p9 = scmp.lt.s32.totalorder %s1417_s22, 5 }
   0xd   : > { %s1867_s26 = smov (%p31_p4, %s1865_s26), 0  ;;  %p1520_p8 = por %p144_p6, %p143_p5 }
   0xe   : > { %s122_s30 = ssub.s32 %s1413_s21, %s1867_s26  ;;  %s127_s5 = sadd.s32 1, %s1397_s17 }
   0xf   : > { %s124_s6 = sor.u32 %s123_s27, %s122_s30  ;;  %p180_p10 = pnand %p1129_p7, %p179_p9 }
  0x10   : > { %p125_p11 = scmp.eq.s32.totalorder %s124_s6, 0  ;;  %p205_p12 = scmp.lt.s32.totalorder (!%p180_p10), %s1405_s19, 1 }
  0x11   : > { %183 = sbr.rel (%p180_p10) target bundleno = 772 (0x304), region = 36  ;;  %s1419_s23 = smov (!%p180_p10), 8  }
  0x12   : > { %s1529_s7 = scalar_select %p125_p11, %s1397_s17, %s127_s5  }
  0x13   : > { %s1173_s9 = smul.u32 (!%p180_p10), 96, %s1401_s18  ;;  %s1420_s24 = smov (!%p180_p10), 4  }
  0x14   : > { %s1422_s11 = smov (!%p180_p10), 24   ;;  %s1423_s27 = smov (!%p180_p10), 112  }
  0x15   : > { %s1424_s30 = smov (!%p180_p10), 96   ;;  %s1425_s5 = smov (!%p180_p10), 80  }
  0x16   : > { %s206_s8 = scalar_select %p205_p12, %s1405_s19, 1  ;;  %vm325_vm0 = vsmask.f32 7424  ;;  %vm466_vm1 = vcmask 1046528   ;;  %vm671_vm2 = vcmask 1041408   ;;  %vm517_vm3 = vcmask 31744  }
  0x17   : > { %vm538_vm4 = vcmask 64512   ;;  %vm600_vm5 = vcmask 97280   ;;  %vm617_vm6 = vcmask 195584   ;;  %vm654_vm7 = vcmask 293888   ;;  %s1426_s6 = smov 64  }
  0x18   : > { %s1215_s10 = smul.u32 216, %s206_s8  ;;  %s1427_s8 = smov 48   ;;  %vm1024_vm8 = vcmask 130048  }
  0x1a   : > { %s209_s13 = scalar_lea.vmem %s1848_s0, %s1215_s10  ;;  %s1421_s10 = smov 12  }
  0x1b   : > { %s1537_s14 = scalar_lea.vmem %s209_s13, %s1173_s9  ;;  %s1428_s9 = smov 32  }
  0x1c   : > { %v1540_v0 = vld [vmem:[%s1537_s14 + $0xc] sm:$0xff]   ;;  %v1303_v1 = vld [vmem:[%s1537_s14 + $0x14] ss:$0 sps:$4 sm:$0x11]   ;;  %v1544_v2 = vld [vmem:[%s1537_s14 + $0x18] sm:$0xff]   ;;  %s1169_s13 = sshll.u32 %s1405_s19, 4 }
  0x1d   : > { %v339_v3 = vshrl.u32 %v1540_v0, 16  ;;  %v341_v4 = vshll.u32 %v1540_v0, 16  ;;  %v346_v5 = vshll.u32 %v1303_v1, 16  ;;  %v470_v6 = vrot.slane %v1540_v0, 1  ;;  %v1554_v16 = vld [vmem:[%s1537_s14 + $0x24] sm:$0xff]   ;;  %v1562_v25 = vld [vmem:[%s1537_s14 + $0x30] sm:$0xff]  }
  0x1e   : > { %v471_v7 = vrot.slane %v1303_v1, 1  ;;  %v1305_v8 = vld [vmem:[%s1537_s14 + $0x20] ss:$0 sps:$4 sm:$0x11]   ;;  %v351_v9 = vshrl.u32 %v1544_v2, 16  ;;  %v353_v10 = vshll.u32 %v1544_v2, 16 }
  0x1f   : > { %v343_v11 = vrot.slane %v341_v4, 1  ;;  %v348_v12 = vrot.slane %v346_v5, 1  ;;  %v358_v15 = vshll.u32 %v1305_v8, 16  ;;  %v1307_v17 = vld [vmem:[%s1537_s14 + $0x2c] ss:$0 sps:$4 sm:$0x11]  }
  0x20   : > { %v472_v13 = vsel %vm466_vm1, %v470_v6, %v471_v7  ;;  %v355_v14 = vrot.slane %v353_v10, 1  ;;  %v473_v19 = vrot.slane %v1544_v2, 1  ;;  %v474_v20 = vrot.slane %v1305_v8, 1  ;;  %v1309_v29 = vld [vmem:[%s1537_s14 + $0x38] ss:$0 sps:$4 sm:$0x11]  }
  0x21   : > { %v344_v18 = vor.u32 %v343_v11, %v339_v3  ;;  %499 = vrot.lane.b32.xlu1 %v472_v13, %s1419_s23  ;;  %v360_v22 = vrot.slane %v358_v15, 1  ;;  %v363_v23 = vshrl.u32 %v1554_v16, 16  ;;  %v365_v24 = vshll.u32 %v1554_v16, 16  ;;  %v1568_v30 = vld [vmem:[%s1537_s14 + $0x3c] sm:$0xff]   ;;  %v1574_v35 = vld [vmem:[%s1537_s14 + $0x48] sm:$0xff]   ;;  %v1583_v47 = vld [vmem:[%s1537_s14 + $0x54] sm:$0xff]  }
  0x22   : > { %v356_v21 = vor.u32 %v355_v14, %v351_v9  ;;  %v370_v27 = vshll.u32 %v1307_v17, 16  ;;  %v476_v28 = vrot.slane %v1554_v16, 1  ;;  %v477_v33 = vrot.slane %v1307_v17, 1  ;;  %v1311_v41 = vld [vmem:[%s1537_s14 + $0x44] ss:$0 sps:$4 sm:$0x11]  }
  0x23   : > { %v349_v26 = vsel %vm325_vm0, %v344_v18, %v348_v12  ;;  %v367_v32 = vrot.slane %v365_v24, 1  ;;  %v375_v34 = vshrl.u32 %v1562_v25, 16  ;;  %v377_v37 = vshll.u32 %v1562_v25, 16  ;;  %v1313_v51 = vld [vmem:[%s1537_s14 + $0x50] ss:$0 sps:$4 sm:$0x11]  }
  0x24   : > { %448 = vrot.lane.b32.xlu0 %v349_v26, %s1420_s24  ;;  %v361_v31 = vsel %vm325_vm0, %v356_v21, %v360_v22  ;;  %v372_v36 = vrot.slane %v370_v27, 1  ;;  %v382_v38 = vshll.u32 %v1309_v29, 16  ;;  %v387_v39 = vshrl.u32 %v1568_v30, 16  ;;  %v1315_v60 = vld [vmem:[%s1537_s14 + $0x5c] ss:$0 sps:$4 sm:$0x11]  }
  0x25   : > { %v368_v40 = vor.u32 %v367_v32, %v363_v23  ;;  %v389_v42 = vshll.u32 %v1568_v30, 16  ;;  %v379_v43 = vrot.slane %v377_v37, 1  ;;  %v394_v46 = vshll.u32 %v1311_v41, 16  ;;  %v1599_v4 = vld [vmem:[%s1537_s14 + $0x60] sm:$0xff]   ;;  %v1604_v9 = vld [vmem:[%s1537_s14 + $0x6c] sm:$0xff]  }
  0x26   : > { %v475_v48 = vsel %vm466_vm1, %v473_v19, %v474_v20  ;;  %v384_v50 = vrot.slane %v382_v38, 1  ;;  %v478_v52 = vsel %vm466_vm1, %v476_v28, %v477_v33  ;;  %v401_v55 = vshll.u32 %v1574_v35, 16  ;;  %v1317_v13 = vld [vmem:[%s1537_s14 + $0x68] ss:$0 sps:$4 sm:$0x11]  }
  0x27   : > { %v373_v44 = vsel %vm325_vm0, %v368_v40, %v372_v36  ;;  %v391_v45 = vrot.slane %v389_v42, 1  ;;  %v380_v49 = vor.u32 %v379_v43, %v375_v34  ;;  %v396_v54 = vrot.slane %v394_v46, 1  ;;  %v1319_v19 = vld [vmem:[%s1537_s14 + $0x74] ss:$0 sps:$4 sm:$0x11]  }
  0x28   : > { %450 = vrot.lane.b32.xlu0 %v361_v31, %s1420_s24  ;;  %452 = vrot.lane.b32.xlu1 %v373_v44, %s1420_s24  ;;  %v479_v56 = vrot.slane %v1562_v25, 1  ;;  %v480_v57 = vrot.slane %v1309_v29, 1  ;;  %v482_v58 = vrot.slane %v1568_v30, 1  ;;  %v406_v59 = vshll.u32 %v1313_v51, 16  ;;  %v1621_v31 = vld [vmem:[%s1537_s14] sm:$0xff]  }
  0x29   : > { %v392_v53 = vor.u32 %v391_v45, %v387_v39  ;;  %v413_v61 = vshll.u32 %v1583_v47, 16  ;;  %v385_v62 = vsel %vm325_vm0, %v380_v49, %v384_v50  ;;  %v483_v63 = vrot.slane %v1311_v41, 1  ;;  %v1321_v40 = vld [vmem:[%s1537_s14 + $0x8] ss:$0 sps:$4 sm:$0x11]   ;;  %s1045_s14 = sadd.s32 %s1401_s18, %s1169_s13 }
  0x2a   : > { %v399_v1 = vshrl.u32 %v1574_v35, 16  ;;  %v403_v3 = vrot.slane %v401_v55, 1  ;;  %v411_v6 = vshrl.u32 %v1583_v47, 16  ;;  %v418_v8 = vshll.u32 %v1315_v60, 16  ;;  %s1170_s19 = sshll.u32 %s1045_s14, 7 }
  0x2b   : > { %v397_v5 = vsel %vm325_vm0, %v392_v53, %v396_v54  ;;  %v415_v7 = vrot.slane %v413_v61, 1  ;;  %v408_v10 = vrot.slane %v406_v59, 1  ;;  %v481_v11 = vsel %vm466_vm1, %v479_v56, %v480_v57 }
  0x2c   : > { %501 = vrot.lane.b32.xlu0 %v475_v48, %s1419_s23  ;;  %503 = vrot.lane.b32.xlu1 %v478_v52, %s1419_s23  ;;  %v404_v12 = vor.u32 %v403_v3, %v399_v1  ;;  %v425_v14 = vshll.u32 %v1599_v4, 16  ;;  %v484_v15 = vsel %vm466_vm1, %v482_v58, %v483_v63  ;;  %v420_v18 = vrot.slane %v418_v8, 1  ;;  %v1322_v63 = vld [vmem:[%s1849_s1 + $0x10] ss:$0 sps:$4 sm:$0x33]   ;;  %v1323_v3 = vld [vmem:[%s1849_s1 + $0x8] sm:$0xff]  }
  0x2d   : > { %v416_v17 = vor.u32 %v415_v7, %v411_v6  ;;  %v437_v20 = vshll.u32 %v1604_v9, 16  ;;  %v485_v21 = vrot.slane %v1574_v35, 1  ;;  %v486_v22 = vrot.slane %v1313_v51, 1  ;;  %1213 = vmatprep.subr.msk.bf16.mxu0 %vm671_vm2, %v1322_v63  ;;  %1214 = vmatprep.subr.msk.bf16.mxu1 %vm671_vm2, %v1322_v63 }
  0x2e   : > { %v488_v23 = vrot.slane %v1583_v47, 1  ;;  %v423_v24 = vshrl.u32 %v1599_v4, 16  ;;  %v409_v26 = vsel %vm325_vm0, %v404_v12, %v408_v10  ;;  %v489_v27 = vrot.slane %v1315_v60, 1 }
  0x2f   : > { %v427_v28 = vrot.slane %v425_v14, 1  ;;  %v430_v29 = vshll.u32 %v1317_v13, 16  ;;  %v421_v32 = vsel %vm325_vm0, %v416_v17, %v420_v18  ;;  %v435_v33 = vshrl.u32 %v1604_v9, 16 }
  0x30   : > { %454 = vrot.lane.b32.xlu0 %v385_v62, %s1420_s24  ;;  %456 = vrot.lane.b32.xlu1 %v397_v5, %s1420_s24  ;;  %v439_v34 = vrot.slane %v437_v20, 1  ;;  %v442_v36 = vshll.u32 %v1319_v19, 16  ;;  %v487_v37 = vsel %vm466_vm1, %v485_v21, %v486_v22  ;;  %v329_v41 = vshll.u32 %v1621_v31, 16  ;;  %v1324_v5 = vld [vmem:[%s1849_s1] sm:$0xff]  }
  0x31   : > { %v428_v38 = vor.u32 %v427_v28, %v423_v24  ;;  %v432_v39 = vrot.slane %v430_v29, 1  ;;  %v490_v42 = vsel %vm466_vm1, %v488_v23, %v489_v27  ;;  %v491_v45 = vrot.slane %v1599_v4, 1 }
  0x32   : > { %v440_v43 = vor.u32 %v439_v34, %v435_v33  ;;  %v444_v44 = vrot.slane %v442_v36, 1  ;;  %v492_v46 = vrot.slane %v1317_v13, 1  ;;  %v327_v49 = vshrl.u32 %v1621_v31, 16 }
  0x33   : > { %v433_v48 = vsel %vm325_vm0, %v428_v38, %v432_v39  ;;  %v331_v50 = vrot.slane %v329_v41, 1  ;;  %v334_v51 = vshll.u32 %v1321_v40, 16  ;;  %v494_v53 = vrot.slane %v1604_v9, 1 }
  0x34   : > { %505 = vrot.lane.b32.xlu0 %v481_v11, %s1419_s23  ;;  %507 = vrot.lane.b32.xlu1 %v484_v15, %s1419_s23  ;;  %v445_v52 = vsel %vm325_vm0, %v440_v43, %v444_v44  ;;  %v495_v54 = vrot.slane %v1319_v19, 1  ;;  %v493_v55 = vsel %vm466_vm1, %v491_v45, %v492_v46  ;;  %v467_v59 = vrot.slane %v1621_v31, 1 }
  0x35   : > { %v332_v56 = vor.u32 %v331_v50, %v327_v49  ;;  %v336_v57 = vrot.slane %v334_v51, 1  ;;  %v468_v60 = vrot.slane %v1321_v40, 1  ;;  %v673_v1 = vsel %vm671_vm2, %v1322_v63, 0 }
  0x36   : > { %v496_v58 = vsel %vm466_vm1, %v494_v53, %v495_v54  ;;  %1186 = vmatpush3.bf16.msra.mxu0 %v673_v1  ;;  %1210 = vmatpush3.bf16.msra.mxu1 %v673_v1 }
  0x37   : > { %v337_v61 = vsel %vm325_vm0, %v332_v56, %v336_v57  ;;  %v469_v62 = vsel %vm466_vm1, %v467_v59, %v468_v60  ;;  %1187 = vmatprep.subr.bf16.mxu0 %v1323_v3  ;;  %1208 = vmatprep.subr.bf16.mxu1 %v1323_v3 }
  0x38   : > { %458 = vrot.lane.b32.xlu0 %v409_v26, %s1420_s24  ;;  %460 = vrot.lane.b32.xlu1 %v421_v32, %s1420_s24 }
  0x3a   : > { %1188 = vmatpush3.bf16.msra.mxu0 %v1323_v3  ;;  %1211 = vmatpush3.bf16.msra.mxu1 %v1323_v3 }
  0x3b   : > { %1189 = vmatprep.subr.bf16.mxu0 %v1324_v5  ;;  %1209 = vmatprep.subr.bf16.mxu1 %v1324_v5 }
  0x3c   : > { %509 = vrot.lane.b32.xlu0 %v487_v37, %s1419_s23  ;;  %511 = vrot.lane.b32.xlu1 %v490_v42, %s1419_s23 }
  0x3e   : > { %1190 = vmatpush3.bf16.msra.mxu0 %v1324_v5  ;;  %1212 = vmatpush3.bf16.msra.mxu1 %v1324_v5 }
  0x40   : > { %462 = vrot.lane.b32.xlu0 %v433_v48, %s1420_s24  ;;  %464 = vrot.lane.b32.xlu1 %v445_v52, %s1420_s24 }
  0x44   : > { %513 = vrot.lane.b32.xlu0 %v493_v55, %s1419_s23  ;;  %515 = vrot.lane.b32.xlu1 %v496_v58, %s1419_s23 }
  0x48   : > { %446 = vrot.lane.b32.xlu0 %v337_v61, %s1420_s24  ;;  %497 = vrot.lane.b32.xlu1 %v469_v62, %s1419_s23 }
  0x93   : > { %v500_v6 = vpop.permute.xlu1 %499 }
  0x96   : > { %v449_v7 = vpop.permute.xlu0 %448 }
  0x97   : > { %v521_v8 = vsel %vm517_vm3, %v1540_v0, %v449_v7 }
  0x98   : > { %v1661_v10 = vsel %vm538_vm4, %v521_v8, %v500_v6 }
  0x99   : > { %567 = vrot.lane.b32.xlu0 %v1661_v10, %s1421_s10 }
  0x9a   : > { %v451_v11 = vpop.permute.xlu0 %450  ;;  %v453_v12 = vpop.permute.xlu1 %452 }
  0x9b   : > { %v523_v13 = vsel %vm517_vm3, %v1544_v2, %v451_v11  ;;  %v525_v18 = vsel %vm517_vm3, %v1554_v16, %v453_v12 }
  0x9e   : > { %v502_v14 = vpop.permute.xlu0 %501  ;;  %v504_v15 = vpop.permute.xlu1 %503 }
  0x9f   : > { %v544_v17 = vsel %vm538_vm4, %v523_v13, %v502_v14  ;;  %v546_v19 = vsel %vm538_vm4, %v525_v18, %v504_v15 }
  0xa0   : > { %569 = vrot.lane.b32.xlu1 %v544_v17, %s1421_s10  ;;  %584 = vrot.lane.b32.xlu0 %v544_v17, %s1422_s11 }
  0xa2   : > { %v455_v0 = vpop.permute.xlu0 %454  ;;  %v457_v20 = vpop.permute.xlu1 %456 }
  0xa3   : > { %v527_v21 = vsel %vm517_vm3, %v1562_v25, %v455_v0  ;;  %v529_v2 = vsel %vm517_vm3, %v1568_v30, %v457_v20 }
  0xa4   : > { %586 = vrot.lane.b32.xlu1 %v546_v19, %s1422_s11  ;;  %571 = vrot.lane.b32.xlu0 %v546_v19, %s1421_s10 }
  0xa6   : > { %v506_v16 = vpop.permute.xlu0 %505  ;;  %v508_v23 = vpop.permute.xlu1 %507 }
  0xa7   : > { %v548_v22 = vsel %vm538_vm4, %v527_v21, %v506_v16  ;;  %v550_v24 = vsel %vm538_vm4, %v529_v2, %v508_v23 }
  0xa8   : > { %573 = vrot.lane.b32.xlu1 %v548_v22, %s1421_s10  ;;  %588 = vrot.lane.b32.xlu0 %v548_v22, %s1422_s11 }
  0xaa   : > { %v459_v26 = vpop.permute.xlu0 %458  ;;  %v461_v27 = vpop.permute.xlu1 %460 }
  0xab   : > { %v531_v25 = vsel %vm517_vm3, %v1574_v35, %v459_v26  ;;  %v533_v30 = vsel %vm517_vm3, %v1583_v47, %v461_v27 }
  0xac   : > { %590 = vrot.lane.b32.xlu1 %v550_v24, %s1422_s11  ;;  %575 = vrot.lane.b32.xlu0 %v550_v24, %s1421_s10 }
  0xae   : > { %v510_v28 = vpop.permute.xlu0 %509  ;;  %v512_v32 = vpop.permute.xlu1 %511 }
  0xaf   : > { %v552_v29 = vsel %vm538_vm4, %v531_v25, %v510_v28  ;;  %v554_v33 = vsel %vm538_vm4, %v533_v30, %v512_v32 }
  0xb0   : > { %577 = vrot.lane.b32.xlu1 %v552_v29, %s1421_s10  ;;  %592 = vrot.lane.b32.xlu0 %v552_v29, %s1422_s11 }
  0xb2   : > { %v463_v34 = vpop.permute.xlu0 %462  ;;  %v465_v36 = vpop.permute.xlu1 %464 }
  0xb3   : > { %v535_v35 = vsel %vm517_vm3, %v1599_v4, %v463_v34  ;;  %v537_v47 = vsel %vm517_vm3, %v1604_v9, %v465_v36 }
  0xb4   : > { %594 = vrot.lane.b32.xlu1 %v554_v33, %s1422_s11  ;;  %579 = vrot.lane.b32.xlu0 %v554_v33, %s1421_s10 }
  0xb6   : > { %v514_v37 = vpop.permute.xlu0 %513  ;;  %v516_v39 = vpop.permute.xlu1 %515 }
  0xb7   : > { %v556_v38 = vsel %vm538_vm4, %v535_v35, %v514_v37  ;;  %v558_v40 = vsel %vm538_vm4, %v537_v47, %v516_v39 }
  0xb8   : > { %581 = vrot.lane.b32.xlu1 %v556_v38, %s1421_s10  ;;  %596 = vrot.lane.b32.xlu0 %v556_v38, %s1422_s11  ;;  %s1429_s10 = smov 16  }
  0xba   : > { %v447_v41 = vpop.permute.xlu0 %446  ;;  %v498_v42 = vpop.permute.xlu1 %497 }
  0xbb   : > { %v519_v4 = vsel %vm517_vm3, %v1621_v31, %v447_v41 }
  0xbc   : > { %598 = vrot.lane.b32.xlu1 %v558_v40, %s1422_s11  ;;  %v540_v43 = vsel %vm538_vm4, %v519_v4, %v498_v42  ;;  %s202_s11 = sand.u32 1, %s1393_s16  }
  0xbd   : > { %s1130_s12 = sshll.u32 %s202_s11, 6 }
  0xbe   : > { %s204_s24 = scalar_lea.vmem [#allocation2], %s1130_s12 }
 0x10b   : > { %v568_v9 = vpop.permute.xlu0 %567 }
 0x10c   : > { %v602_v44 = vsel %vm600_vm5, %v540_v43, %v568_v9 }
 0x112   : > { %v570_v45 = vpop.permute.xlu1 %569  ;;  %v585_v46 = vpop.permute.xlu0 %584 }
 0x113   : > { %v619_v48 = vsel %vm617_vm6, %v602_v44, %v585_v46  ;;  %v604_v31 = vsel %vm600_vm5, %v1661_v10, %v570_v45 }
 0x114   : > { %1191 = vmatprep.mubr.msk.bf16.mxu0 %vm654_vm7, %v619_v48 }
 0x116   : > { %v587_v49 = vpop.permute.xlu1 %586  ;;  %v572_v50 = vpop.permute.xlu0 %571 }
 0x117   : > { %v621_v51 = vsel %vm617_vm6, %v604_v31, %v587_v49  ;;  %v606_v52 = vsel %vm600_vm5, %v544_v17, %v572_v50  ;;  %v1735_v17 = vld [vmem:[%s1850_s2] ss:$0 sm:$0xff] }
 0x118   : > { %1192 = vmatmul.mubr.msk.bf16.vlgmr.msra.gmra.mxu0 %vm654_vm7, %v621_v51 }
 0x11a   : > { %v574_v53 = vpop.permute.xlu1 %573  ;;  %v589_v54 = vpop.permute.xlu0 %588 }
 0x11b   : > { %v623_v55 = vsel %vm617_vm6, %v606_v52, %v589_v54  ;;  %v608_v56 = vsel %vm600_vm5, %v546_v19, %v574_v53  ;;  %v1741_v19 = vld [vmem:[%s1851_s3] ss:$0 sm:$0xff] }
 0x11c   : > { %1195 = vmatprep.mubr.msk.bf16.mxu0 %vm654_vm7, %v623_v55 }
 0x11e   : > { %v591_v57 = vpop.permute.xlu1 %590  ;;  %v576_v58 = vpop.permute.xlu0 %575 }
 0x11f   : > { %v625_v59 = vsel %vm617_vm6, %v608_v56, %v591_v57  ;;  %v610_v60 = vsel %vm600_vm5, %v548_v22, %v576_v58 }
 0x120   : > { %1196 = vmatmul.mubr.msk.bf16.gmra.mxu0 %vm654_vm7, %v625_v59 }
 0x122   : > { %v578_v61 = vpop.permute.xlu1 %577  ;;  %v593_v62 = vpop.permute.xlu0 %592 }
 0x123   : > { %v627_v63 = vsel %vm617_vm6, %v610_v60, %v593_v62  ;;  %v612_v1 = vsel %vm600_vm5, %v550_v24, %v578_v61 }
 0x124   : > { %1199 = vmatprep.mubr.msk.bf16.mxu1 %vm654_vm7, %v627_v63 }
 0x126   : > { %v595_v3 = vpop.permute.xlu1 %594  ;;  %v580_v5 = vpop.permute.xlu0 %579 }
 0x127   : > { %v629_v6 = vsel %vm617_vm6, %v612_v1, %v595_v3  ;;  %v614_v7 = vsel %vm600_vm5, %v552_v29, %v580_v5 }
 0x128   : > { %1200 = vmatmul.mubr.msk.bf16.vlgmr.msra.gmra.mxu1 %vm654_vm7, %v629_v6 }
 0x12a   : > { %v582_v8 = vpop.permute.xlu1 %581  ;;  %v597_v10 = vpop.permute.xlu0 %596 }
 0x12b   : > { %v631_v11 = vsel %vm617_vm6, %v614_v7, %v597_v10  ;;  %v616_v12 = vsel %vm600_vm5, %v554_v33, %v582_v8 }
 0x12c   : > { %1203 = vmatprep.mubr.msk.bf16.mxu1 %vm654_vm7, %v631_v11 }
 0x12e   : > { %v599_v13 = vpop.permute.xlu1 %598 }
 0x12f   : > { %v633_v14 = vsel %vm617_vm6, %v616_v12, %v599_v13 }
 0x130   : > { %1204 = vmatmul.mubr.msk.bf16.gmra.mxu1 %vm654_vm7, %v633_v14 }
 0x1d8   : > { %v1193_v15 = vpop.f32.mrf.mxu0 }
 0x1d9   : > { %v781_v16 = vmul.f32 %v1193_v15, %v1735_v17 }
 0x1da   : > { %v709_v18 = vpop.f32.mrf.mxu0 }
 0x1db   : > { %v779_v0 = vmul.f32 %v1735_v17, %v709_v18  ;;  %v804_v25 = vadd.f32 %v1741_v19, %v781_v16  ;;  %v893_v16 = vlaneseq }
 0x1dc   : > { %v1194_v20 = vpop.f32.mrf.mxu0 }
 0x1dd   : > { %v802_v21 = vadd.f32 %v1741_v19, %v779_v0  ;;  %v782_v30 = vmul.f32 %v1194_v20, %v1735_v17  ;;  %v820_v32 = vmax.f32 %v804_v25, 0.0 }
 0x1de   : > { %v712_v2 = vpop.f32.mrf.mxu0 }
 0x1df   : > { %v780_v22 = vmul.f32 %v1735_v17, %v712_v2  ;;  %v818_v23 = vmax.f32 %v802_v21, 0.0  ;;  %v805_v33 = vadd.f32 %v1741_v19, %v782_v30  ;;  %v1430_v21 = vmov 1983009808  }
 0x1e0   : > { %v1197_v24 = vpop.f32.mrf.mxu0  ;;  %v891_v2 = vunpack.c.l.s4 %v1430_v21 }
 0x1e1   : > { %v803_v26 = vadd.f32 %v1741_v19, %v780_v22  ;;  %834 = vxpose.xlu0.b32.start [1/16] (narrow) %v818_v23, 8  ;;  %v821_v35 = vmax.f32 %v805_v33, 0.0  ;;  %v785_v39 = vmul.f32 %v1197_v24, %v1735_v17  ;;  %v894_v24 = vshrl.u32 %v893_v16, 7 }
 0x1e2   : > { %v725_v27 = vpop.f32.mrf.mxu0  ;;  %v892_v23 = vunpack.c.0.s8 %v891_v2 }
 0x1e3   : > { %v819_v28 = vmax.f32 %v803_v26, 0.0  ;;  %v783_v34 = vmul.f32 %v1735_v17, %v725_v27  ;;  %v808_v42 = vadd.f32 %v1741_v19, %v785_v39  ;;  %v1431_v27 = vmov 1934713408  }
 0x1e4   : > { %v1198_v29 = vpop.f32.mrf.mxu0  ;;  %v955_v25 = vunpack.c.l.s4 %v1431_v27 }
 0x1e5   : > { %835 = vxpose.xlu0.b32.cont [2/16] (narrow) %v819_v28, 8  ;;  %v806_v47 = vadd.f32 %v1741_v19, %v783_v34  ;;  %v786_v43 = vmul.f32 %v1198_v29, %v1735_v17  ;;  %v824_v45 = vmax.f32 %v808_v42, 0.0  ;;  %v895_v28 = vsub.s32 %v892_v23, %v894_v24 }
 0x1e6   : > { %v728_v36 = vpop.f32.mrf.mxu0 }
 0x1e7   : > { %v784_v37 = vmul.f32 %v1735_v17, %v728_v36  ;;  %v822_v40 = vmax.f32 %v806_v47, 0.0  ;;  %v809_v46 = vadd.f32 %v1741_v19, %v786_v43  ;;  %v956_v36 = vunpack.c.0.s8 %v955_v25 }
 0x1e8   : > { %v1201_v38 = vpop.f32.mrf.mxu1 }
 0x1e9   : > { %836 = vxpose.xlu0.b32.cont [3/16] (narrow) %v820_v32, 8  ;;  %v807_v41 = vadd.f32 %v1741_v19, %v784_v37  ;;  %v825_v49 = vmax.f32 %v809_v46, 0.0  ;;  %v789_v53 = vmul.f32 %v1201_v38, %v1735_v17  ;;  %v959_v43 = vsub.s32 %v956_v36, %v894_v24 }
 0x1ea   : > { %v741_v4 = vpop.f32.mrf.mxu1 }
 0x1eb   : > { %v823_v9 = vmax.f32 %v807_v41, 0.0  ;;  %v787_v48 = vmul.f32 %v1735_v17, %v741_v4  ;;  %v812_v57 = vadd.f32 %v1741_v19, %v789_v53 }
 0x1ec   : > { %v1202_v44 = vpop.f32.mrf.mxu1 }
 0x1ed   : > { %837 = vxpose.xlu0.b32.cont [4/16] (narrow) %v821_v35, 8  ;;  %v810_v50 = vadd.f32 %v1741_v19, %v787_v48  ;;  %v790_v58 = vmul.f32 %v1202_v44, %v1735_v17  ;;  %v828_v61 = vmax.f32 %v812_v57, 0.0 }
 0x1ee   : > { %v744_v31 = vpop.f32.mrf.mxu1 }
 0x1ef   : > { %v788_v51 = vmul.f32 %v1735_v17, %v744_v31  ;;  %v826_v54 = vmax.f32 %v810_v50, 0.0  ;;  %v813_v62 = vadd.f32 %v1741_v19, %v790_v58 }
 0x1f0   : > { %v1205_v52 = vpop.f32.mrf.mxu1 }
 0x1f1   : > { %838 = vxpose.xlu0.b32.cont [5/16] (narrow) %v822_v40, 8  ;;  %v811_v55 = vadd.f32 %v1741_v19, %v788_v51  ;;  %v829_v3 = vmax.f32 %v813_v62, 0.0  ;;  %v793_v7 = vmul.f32 %v1205_v52, %v1735_v17 }
 0x1f2   : > { %v757_v56 = vpop.f32.mrf.mxu1 }
 0x1f3   : > { %v827_v59 = vmax.f32 %v811_v55, 0.0  ;;  %v791_v63 = vmul.f32 %v1735_v17, %v757_v56  ;;  %v816_v11 = vadd.f32 %v1741_v19, %v793_v7 }
 0x1f4   : > { %v1206_v60 = vpop.f32.mrf.mxu1 }
 0x1f5   : > { %839 = vxpose.xlu0.b32.cont [6/16] (narrow) %v823_v9, 8  ;;  %v814_v5 = vadd.f32 %v1741_v19, %v791_v63  ;;  %v794_v12 = vmul.f32 %v1206_v60, %v1735_v17  ;;  %v832_v14 = vmax.f32 %v816_v11, 0.0 }
 0x1f6   : > { %v760_v1 = vpop.f32.mrf.mxu1 }
 0x1f7   : > { %v792_v6 = vmul.f32 %v1735_v17, %v760_v1  ;;  %v830_v8 = vmax.f32 %v814_v5, 0.0  ;;  %v817_v15 = vadd.f32 %v1741_v19, %v794_v12 }
 0x1f9   : > { %840 = vxpose.xlu0.b32.cont [7/16] (narrow) %v824_v45, 8  ;;  %v815_v10 = vadd.f32 %v1741_v19, %v792_v6  ;;  %v833_v18 = vmax.f32 %v817_v15, 0.0 }
 0x1fb   : > { %v831_v13 = vmax.f32 %v815_v10, 0.0 }
 0x1fd   : > { %841 = vxpose.xlu0.b32.cont [8/16] (narrow) %v825_v49, 8 }
 0x201   : > { %842 = vxpose.xlu0.b32.cont [9/16] (narrow) %v826_v54, 8 }
 0x205   : > { %843 = vxpose.xlu0.b32.cont [10/16] (narrow) %v827_v59, 8 }
 0x209   : > { %844 = vxpose.xlu0.b32.cont [11/16] (narrow) %v828_v61, 8 }
 0x20d   : > { %845 = vxpose.xlu0.b32.cont [12/16] (narrow) %v829_v3, 8 }
 0x211   : > { %846 = vxpose.xlu0.b32.cont [13/16] (narrow) %v830_v8, 8 }
 0x215   : > { %847 = vxpose.xlu0.b32.cont [14/16] (narrow) %v831_v13, 8 }
 0x219   : > { %848 = vxpose.xlu0.b32.cont [15/16] (narrow) %v832_v14, 8 }
 0x21d   : > { %849 = vxpose.xlu0.b32.end [16/16] (narrow) %v833_v18, 8 }
 0x25d   : > { %v850_v0 = vpop.trf.xlu0 }
 0x25e   : > { %867 = vrot.lane.b32.xlu1 %v850_v0, %s1423_s27  ;;  %s1048_s27 = sshll.u32 %s204_s24, 4  ;;  %s1784_s27 = int_to_ptr.vmem [resolvable:$true] %s1048_s27 }
 0x262   : > { %870 = vrot.lane.b32.xlu1 %v850_v0, %s1424_s30 }
 0x266   : > { %873 = vrot.lane.b32.xlu1 %v850_v0, %s1425_s5  ;;  %s1782_s5 = scalar_lea.hbm %s1852_s4, %s1170_s19 }
 0x26a   : > { %876 = vrot.lane.b32.xlu1 %v850_v0, %s1426_s6  ;;  %s1796_s6 = scalar_lea.sflag [#allocation3], %s202_s11 }
 0x26e   : > { %879 = vrot.lane.b32.xlu1 %v850_v0, %s1427_s8  ;;  %s1325_s8 = scalar_lea.vmem %s1784_s27, 1024 }
 0x26f   : > { %p1326_p13 = scmp.ne.s32.totalorder %s1784_s27, %s1325_s8 }
 0x271   : > { %p1327_p0 = pnand %p1326_p13, %p1511_p3 }
 0x272   : > { %882 = vrot.lane.b32.xlu1 %v850_v0, %s1428_s9  ;;  %s1432_s9 = smov [#allocation2]  }
 0x273   : > { %p1328_p1 = pneg %p1327_p0 }
 0x276   : > { %885 = vrot.lane.b32.xlu1 %v850_v0, %s1429_s10  ;;  %s1329_s10 = sshll.u32 %s1432_s9, 4  ;;  %s1330_s10 = int_to_ptr.vmem [resolvable:$false] %s1329_s10 }
 0x277   : > { %s1331_s12 = scalar_lea.vmem %s1330_s10, 2048  ;;  %p1332_p2 = scmp.lt.s32.totalorder %s1784_s27, %s1330_s10 }
 0x278   : > { %p1333_p4 = scmp.lt.s32.totalorder %s1331_s12, %s1325_s8 }
 0x27a   : > { %p1334_p5 = por %p1333_p4, %p1332_p2 }
 0x27c   : > { %p1335_p6 = pnand %p1334_p5, %p1328_p1 }
 0x2d0   : > { %v868_v17 = vpop.permute.xlu1 %867 }
 0x2d4   : > { %v871_v19 = vpop.permute.xlu1 %870 }
 0x2d5   : > { %v888_v29 = vcombine.low %v850_v0, %v871_v19  ;;  %v889_v34 = vcombine.high %v850_v0, %v871_v19 }
 0x2d7   : > { %v896_v38 = vrot.slane %v888_v29, %v895_v28  ;;  %v903_v42 = vrot.slane %v889_v34, %v895_v28 }
 0x2d8   : > { %v874_v20 = vpop.permute.xlu1 %873 }
 0x2d9   : > { %v904_v30 = vcombine.low %v868_v17, %v874_v20  ;;  %v905_v32 = vcombine.high %v868_v17, %v874_v20 }
 0x2db   : > { %v912_v35 = vrot.slane %v904_v30, %v895_v28  ;;  %v919_v39 = vrot.slane %v905_v32, %v895_v28 }
 0x2dc   : > { %v877_v22 = vpop.permute.xlu1 %876 }
 0x2dd   : > { %v952_v9 = vcombine.low %v896_v38, %v912_v35  ;;  %v953_v44 = vcombine.high %v896_v38, %v912_v35  ;;  %v968_v49 = vcombine.low %v903_v42, %v919_v39  ;;  %v969_v50 = vcombine.high %v903_v42, %v919_v39 }
 0x2df   : > { %v960_v55 = vrot.slane %v952_v9, %v959_v43  ;;  %v967_v56 = vrot.slane %v953_v44, %v959_v43  ;;  %v976_v61 = vrot.slane %v968_v49, %v959_v43  ;;  %v983_v62 = vrot.slane %v969_v50, %v959_v43 }
 0x2e0   : > { %v880_v26 = vpop.permute.xlu1 %879 }
 0x2e4   : > { %v883_v33 = vpop.permute.xlu1 %882 }
 0x2e5   : > { %v920_v47 = vcombine.low %v877_v22, %v883_v33  ;;  %v921_v37 = vcombine.high %v877_v22, %v883_v33 }
 0x2e7   : > { %v928_v45 = vrot.slane %v920_v47, %v895_v28  ;;  %v935_v46 = vrot.slane %v921_v37, %v895_v28 }
 0x2e8   : > { %v886_v40 = vpop.permute.xlu1 %885 }
 0x2e9   : > { %v936_v41 = vcombine.low %v880_v26, %v886_v40  ;;  %v937_v4 = vcombine.high %v880_v26, %v886_v40 }
 0x2eb   : > { %v944_v48 = vrot.slane %v936_v41, %v895_v28  ;;  %v951_v31 = vrot.slane %v937_v4, %v895_v28 }
 0x2ed   : > { %v984_v51 = vcombine.low %v928_v45, %v944_v48  ;;  %v985_v52 = vcombine.high %v928_v45, %v944_v48  ;;  %v1000_v53 = vcombine.low %v935_v46, %v951_v31  ;;  %v1001_v54 = vcombine.high %v935_v46, %v951_v31 }
 0x2ef   : > { %v992_v57 = vrot.slane %v984_v51, %v959_v43  ;;  %v999_v58 = vrot.slane %v985_v52, %v959_v43  ;;  %v1008_v59 = vrot.slane %v1000_v53, %v959_v43  ;;  %v1015_v60 = vrot.slane %v1001_v54, %v959_v43 }
 0x2f1   : > { %v1016_v63 = vcombine.low %v960_v55, %v992_v57  ;;  %v1017_v1 = vcombine.high %v960_v55, %v992_v57  ;;  %v1018_v3 = vcombine.low %v967_v56, %v999_v58  ;;  %v1019_v5 = vcombine.high %v967_v56, %v999_v58 }
 0x2f2   : > { %v1020_v6 = vcombine.low %v976_v61, %v1008_v59  ;;  %v1021_v7 = vcombine.high %v976_v61, %v1008_v59  ;;  %v1022_v8 = vcombine.low %v983_v62, %v1015_v60  ;;  %v1023_v10 = vcombine.high %v983_v62, %v1015_v60 }
 0x2f3   : > { %1025 = vst.msk [vmem:[%s204_s24] sm:$0xff] %vm1024_vm8, %v1016_v63  ;;  %1026 = vst.msk [vmem:[%s204_s24 + $0x8] sm:$0xff] %vm1024_vm8, %v1017_v1 }
 0x2f4   : > { %1027 = vst.msk [vmem:[%s204_s24 + $0x10] sm:$0xff] %vm1024_vm8, %v1018_v3  ;;  %1028 = vst.msk [vmem:[%s204_s24 + $0x18] sm:$0xff] %vm1024_vm8, %v1019_v5 }
 0x2f5   : > { %1029 = vst.msk [vmem:[%s204_s24 + $0x20] sm:$0xff] %vm1024_vm8, %v1020_v6  ;;  %1030 = vst.msk [vmem:[%s204_s24 + $0x28] sm:$0xff] %vm1024_vm8, %v1021_v7 }
 0x2f6   : > { %1031 = vst.msk [vmem:[%s204_s24 + $0x30] sm:$0xff] %vm1024_vm8, %v1022_v8  ;;  %1032 = vst.msk [vmem:[%s204_s24 + $0x38] sm:$0xff] %vm1024_vm8, %v1023_v10 }
 0x2f7   : > { %1338 = shalt.err (!%p1335_p6)
}
 0x2f8   : > { %s1339_s11 = scalar_lea.hbm %s1782_s5, 1024  ;;  %s1343_s19 = scalar_lea.hbm %s1852_s4, 4096 }
 0x2f9   : > { %p1340_p7 = scmp.ne.s32.totalorder %s1782_s5, %s1339_s11  ;;  %p1344_p11 = scmp.lt.s32.totalorder %s1782_s5, %s1852_s4 }
 0x2fa   : > { %p1345_p12 = scmp.lt.s32.totalorder %s1343_s19, %s1339_s11 }
 0x2fb   : > { %p1341_p9 = pnand %p1340_p7, %p1511_p3 }
 0x2fc   : > { %p1346_p13 = por %p1345_p12, %p1344_p11 }
 0x2fd   : > { %p1342_p10 = pneg %p1341_p9 }
 0x2ff   : > { %p1347_p0 = pnand %p1346_p13, %p1342_p10 }
 0x301   : > { %1350 = shalt.err (!%p1347_p0)
}
 0x302   : > { %s1433_s30 = smov 128   ;;  %s1434_s8 = smov 256  }
 0x303   : > { %1216 = dma.vmem_to_hbm [thread:$0]  (%p1511_p3), %s1784_s27, 1024, %s1782_s5, %s1796_s6, %s1433_s30, %s1434_s8, %s1419_s23  }
 0x304 PF: > { %p1222_p1 = scmp.ge.s32.totalorder %s1417_s22, 2  ;;  %s1063_s9 = sand.u32 1, %s1389_s15  }
 0x305   : > { %s1064_s10 = scalar_lea.sflag [#allocation3], %s1063_s9 }
 0x306   : > { %p1219_p2 = pnand %p1222_p1, %p1520_p8 }
 0x308   : > { %p1220_p4 = pneg %p1219_p2 }
 0x30a   : > { %1384 = dma.done.wait (%p1220_p4), %s1064_s10, 1024  }
 0x30b   : > { %1386 = vsyncadd (%p1220_p4), %s1064_s10, 4294966272  ;;  %s17_s22 = sadd.s32 1, %s1417_s22   ;;  %s1855_s15 = smov %s1393_s16 }
 0x30c   : > { %p14_p5 = scmp.ge.s32.totalorder %s17_s22, 6   ;;  %s1856_s16 = smov %s1397_s17 }
 0x30d   : > { %s1857_s17 = smov %s1529_s7  ;;  %s1858_s18 = smov %s1409_s20 }
 0x30e   : > { %s1859_s19 = smov %s1413_s21  ;;  %s1860_s20 = smov %s1863_s25 }
 0x30f   : > { %s1861_s21 = smov %s1867_s26  ;;  %16 = sbr.rel (!%p14_p5) target bundleno = 5 (0x5), region = 72 }
 0x314   :  { %1069 = vsyncpa [#allocation3], 1 }
 0x315   :  { %1071 = vsyncpa [#allocation3 + $0x1], 1 }

</bundles_post_ra>
